<compile_context>
chip_gen: v7x
topology: tpu7x:2x2x1
jax: 0.10.0
libtpu: 0.0.40
codegen_flags: <defaults>
</compile_context>

<pallas_src>
import jax
import jax.numpy as jnp
from jax.experimental import pallas as pl
from jax.experimental.pallas import tpu as pltpu

CLINICAL_NUMBER = 20
Z_DIM = 1024
IN_DIM = Z_DIM + CLINICAL_NUMBER   # 1044
HID_DIM = 512
OUT_DIM = 2


def _round_up(x, m):
    return ((x + m - 1) // m) * m


def _mlp_kernel(z_ref, cli_ref, w1z_ref, w1c_ref, b1_ref, w2_ref, b2_ref, o_ref):
    # Hidden layer with the concat fused as a split matmul (f32 accumulation):
    #   h = z @ W1[:1024, :] + cli @ W1[1024:, :] + b1 ; ReLU
    h = jnp.dot(z_ref[...], w1z_ref[...], preferred_element_type=jnp.float32)
    h = h + jnp.dot(cli_ref[...], w1c_ref[...], preferred_element_type=jnp.float32)
    h = jnp.maximum(h + b1_ref[...], 0.0)
    # Output layer: (TB, 512) @ (512, 2) + (1, 2).  N=2 is tiny; keep it in f32.
    o = jnp.dot(h, w2_ref[...], preferred_element_type=jnp.float32)
    o_ref[...] = (o + b2_ref[...]).astype(o_ref.dtype)


def net_forward(z, cli, w1_z, w1_c, b1, w2, b2, *, max_batch_tile=512):
    """Forward pass of `net`.

    z:    (B, 1024)
    cli:  (B, 20)
    w1_z: (1024, 512)   rows [:1024]  of W1^T   (W1 is PyTorch's (512, 1044))
    w1_c: (20, 512)     rows [1024:]  of W1^T
    b1:   (512,)
    w2:   (512, 2)      W2^T
    b2:   (2,)
    """
    B = z.shape[0]

    # Batch tile: multiple of 8 sublanes, capped so two buffers of the
    # activation tile + weights fit comfortably in VMEM on all generations
    # (TB=512: ~2 MB double-buffered bf16 activations + ~1 MB bf16 weights).
    TB = min(max_batch_tile, _round_up(B, 8))
    Bp = _round_up(B, TB)
    if Bp != B:
        z = jnp.pad(z, ((0, Bp - B), (0, 0)))
        cli = jnp.pad(cli, ((0, Bp - B), (0, 0)))

    # bf16 inputs / weights, f32 accumulation inside the kernel.
    z_in = z.astype(jnp.bfloat16)
    cli_in = cli.astype(jnp.bfloat16)
    w1z_in = w1_z.astype(jnp.bfloat16)
    w1c_in = w1_c.astype(jnp.bfloat16)
    b1_2d = b1.reshape(1, HID_DIM).astype(jnp.float32)
    w2_in = w2.astype(jnp.float32)
    b2_2d = b2.reshape(1, OUT_DIM).astype(jnp.float32)

    n_tiles = Bp // TB
    flops = 2 * Bp * Z_DIM * HID_DIM + 2 * Bp * CLINICAL_NUMBER * HID_DIM \
        + 2 * Bp * HID_DIM * OUT_DIM
    bytes_accessed = (
        z_in.size * 2 + cli_in.size * 2            # bf16 activations in
        + w1z_in.size * 2 + w1c_in.size * 2        # bf16 W1
        + (b1_2d.size + w2_in.size + b2_2d.size) * 4
        + Bp * OUT_DIM * 4                         # f32 output
    )

    out = pl.pallas_call(
        _mlp_kernel,
        out_shape=jax.ShapeDtypeStruct((Bp, OUT_DIM), jnp.float32),
        grid=(n_tiles,),
        in_specs=[
            pl.BlockSpec((TB, Z_DIM), lambda i: (i, 0)),
            pl.BlockSpec((TB, CLINICAL_NUMBER), lambda i: (i, 0)),
            # Weights / biases: constant index_map -> stay VMEM-resident
            # across batch-grid steps.
            pl.BlockSpec((Z_DIM, HID_DIM), lambda i: (0, 0)),
            pl.BlockSpec((CLINICAL_NUMBER, HID_DIM), lambda i: (0, 0)),
            pl.BlockSpec((1, HID_DIM), lambda i: (0, 0)),
            pl.BlockSpec((HID_DIM, OUT_DIM), lambda i: (0, 0)),
            pl.BlockSpec((1, OUT_DIM), lambda i: (0, 0)),
        ],
        out_specs=pl.BlockSpec((TB, OUT_DIM), lambda i: (i, 0)),
        compiler_params=pltpu.CompilerParams(
            dimension_semantics=("parallel",),
        ),
        cost_estimate=pl.CostEstimate(
            flops=flops, transcendentals=0, bytes_accessed=bytes_accessed),
    )(z_in, cli_in, w1z_in, w1c_in, b1_2d, w2_in, b2_2d)

    return out[:B] if Bp != B else out


def init_params(key):
    """Deterministic params matching nn.Linear(1044,512) / nn.Linear(512,2).

    U(-1/sqrt(fan_in), 1/sqrt(fan_in)) like PyTorch's default init.  W1 is
    stored transposed and split into its z / clinical row blocks so the kernel
    fuses the concat.
    """
    k1, k2, k3, k4 = jax.random.split(key, 4)
    lim1 = 1.0 / jnp.sqrt(IN_DIM)
    lim2 = 1.0 / jnp.sqrt(HID_DIM)
    w1 = jax.random.uniform(k1, (IN_DIM, HID_DIM), jnp.float32, -lim1, lim1)
    b1 = jax.random.uniform(k2, (HID_DIM,), jnp.float32, -lim1, lim1)
    w2 = jax.random.uniform(k3, (HID_DIM, OUT_DIM), jnp.float32, -lim2, lim2)
    b2 = jax.random.uniform(k4, (OUT_DIM,), jnp.float32, -lim2, lim2)
    w1_z, w1_c = w1[:Z_DIM], w1[Z_DIM:]
    return w1_z, w1_c, b1, w2, b2


if __name__ == "__main__":
    key = jax.random.PRNGKey(0)
    k_z, k_c, k_p = jax.random.split(key, 3)

    B = 8  # small batch
    z = jax.random.normal(k_z, (B, Z_DIM), jnp.float32)
    cli = jax.random.normal(k_c, (B, CLINICAL_NUMBER), jnp.float32)
    w1_z, w1_c, b1, w2, b2 = init_params(k_p)

    out = net_forward(z, cli, w1_z, w1_c, b1, w2, b2)
    out = jax.block_until_ready(out)

    # Pure-JAX reference of the same math, with inputs/W1 quantized to bf16
    # exactly as the kernel sees them (accumulation in f32).
    z_q = z.astype(jnp.bfloat16).astype(jnp.float32)
    cli_q = cli.astype(jnp.bfloat16).astype(jnp.float32)
    w1_q = jnp.concatenate([w1_z, w1_c], axis=0).astype(jnp.bfloat16).astype(jnp.float32)
    x_q = jnp.concatenate([z_q, cli_q], axis=1)
    h_ref = jnp.maximum(
        jnp.dot(x_q, w1_q, preferred_element_type=jnp.float32) + b1, 0.0)
    ref = jnp.dot(h_ref, w2, preferred_element_type=jnp.float32) + b2

    assert out.shape == (B, OUT_DIM)
    assert jnp.allclose(out, ref, atol=1e-2, rtol=1e-2), (
        float(jnp.max(jnp.abs(out - ref))))

    print("KERNEL_OK")
</pallas_src>

<mosaic_0001>
module attributes {stable_mosaic.version = 11 : i64} {
  func.func @_mlp_kernel(%arg0: i32, %arg1: memref<8x1024xbf16, #tpu.memory_space<vmem>>, %arg2: memref<8x20xbf16, #tpu.memory_space<vmem>>, %arg3: memref<1024x512xbf16, #tpu.memory_space<vmem>>, %arg4: memref<20x512xbf16, #tpu.memory_space<vmem>>, %arg5: memref<1x512xf32, #tpu.memory_space<vmem>>, %arg6: memref<512x2xf32, #tpu.memory_space<vmem>>, %arg7: memref<1x2xf32, #tpu.memory_space<vmem>>, %arg8: memref<8x2xf32, #tpu.memory_space<vmem>>) attributes {dimension_semantics = [#tpu.dimension_semantics<parallel>], iteration_bounds = array<i64: 1>, scalar_prefetch = 0 : i64, scratch_operands = 0 : i64, tpu.core_type = #tpu.core_type<tc>, window_params = [{transform_indices = @transform_0, window_bounds = array<i64: 8, 1024>}, {transform_indices = @transform_1, window_bounds = array<i64: 8, 20>}, {pipeline_mode = #tpu.pipeline_mode<synchronous>, transform_indices = @transform_2, window_bounds = array<i64: 1024, 512>}, {pipeline_mode = #tpu.pipeline_mode<synchronous>, transform_indices = @transform_3, window_bounds = array<i64: 20, 512>}, {pipeline_mode = #tpu.pipeline_mode<synchronous>, transform_indices = @transform_4, window_bounds = array<i64: 1, 512>}, {pipeline_mode = #tpu.pipeline_mode<synchronous>, transform_indices = @transform_5, window_bounds = array<i64: 512, 2>}, {pipeline_mode = #tpu.pipeline_mode<synchronous>, transform_indices = @transform_6, window_bounds = array<i64: 1, 2>}, {transform_indices = @transform_7, window_bounds = array<i64: 8, 2>}]} {
    %c0 = arith.constant 0 : index
    %c0_0 = arith.constant 0 : index
    %0 = vector.load %arg1[%c0, %c0_0] : memref<8x1024xbf16, #tpu.memory_space<vmem>>, vector<8x1024xbf16>
    %c0_1 = arith.constant 0 : index
    %c0_2 = arith.constant 0 : index
    %1 = vector.load %arg3[%c0_1, %c0_2] : memref<1024x512xbf16, #tpu.memory_space<vmem>>, vector<1024x512xbf16>
    %cst = arith.constant dense<0.000000e+00> : vector<8x512xf32>
    %2 = tpu.matmul %0, %1, %cst {dimension_numbers = #tpu.dot_dimension_numbers<[1], [0], [0], [1], [0, 0, 1, 1], [], []>} : vector<8x1024xbf16>, vector<1024x512xbf16>, vector<8x512xf32> -> vector<8x512xf32>
    %c0_3 = arith.constant 0 : index
    %c0_4 = arith.constant 0 : index
    %3 = vector.load %arg2[%c0_3, %c0_4] : memref<8x20xbf16, #tpu.memory_space<vmem>>, vector<8x20xbf16>
    %c0_5 = arith.constant 0 : index
    %c0_6 = arith.constant 0 : index
    %4 = vector.load %arg4[%c0_5, %c0_6] : memref<20x512xbf16, #tpu.memory_space<vmem>>, vector<20x512xbf16>
    %cst_7 = arith.constant dense<0.000000e+00> : vector<8x512xf32>
    %5 = tpu.matmul %3, %4, %cst_7 {dimension_numbers = #tpu.dot_dimension_numbers<[1], [0], [0], [1], [0, 0, 1, 1], [], []>} : vector<8x20xbf16>, vector<20x512xbf16>, vector<8x512xf32> -> vector<8x512xf32>
    %6 = arith.addf %2, %5 : vector<8x512xf32>
    %c0_8 = arith.constant 0 : index
    %c0_9 = arith.constant 0 : index
    %7 = vector.load %arg5[%c0_8, %c0_9] : memref<1x512xf32, #tpu.memory_space<vmem>>, vector<1x512xf32>
    %8 = vector.broadcast %7 : vector<1x512xf32> to vector<8x512xf32>
    %9 = arith.addf %6, %8 : vector<8x512xf32>
    %cst_10 = arith.constant 0.000000e+00 : f32
    %10 = vector.broadcast %cst_10 : f32 to vector<8x512xf32>
    %11 = arith.maximumf %9, %10 : vector<8x512xf32>
    %c0_11 = arith.constant 0 : index
    %c0_12 = arith.constant 0 : index
    %12 = vector.load %arg6[%c0_11, %c0_12] : memref<512x2xf32, #tpu.memory_space<vmem>>, vector<512x2xf32>
    %cst_13 = arith.constant dense<0.000000e+00> : vector<8x2xf32>
    %13 = tpu.matmul %11, %12, %cst_13 {dimension_numbers = #tpu.dot_dimension_numbers<[1], [0], [0], [1], [0, 0, 1, 1], [], []>} : vector<8x512xf32>, vector<512x2xf32>, vector<8x2xf32> -> vector<8x2xf32>
    %c0_14 = arith.constant 0 : index
    %c0_15 = arith.constant 0 : index
    %14 = vector.load %arg7[%c0_14, %c0_15] : memref<1x2xf32, #tpu.memory_space<vmem>>, vector<1x2xf32>
    %15 = vector.broadcast %14 : vector<1x2xf32> to vector<8x2xf32>
    %16 = arith.addf %13, %15 : vector<8x2xf32>
    %c0_16 = arith.constant 0 : index
    %c0_17 = arith.constant 0 : index
    %17 = vector.load %arg8[%c0_16, %c0_17] : memref<8x2xf32, #tpu.memory_space<vmem>>, vector<8x2xf32>
    tpu.vector_store %arg8[%c0_16, %c0_17], %16 {strides = array<i32>} : memref<8x2xf32, #tpu.memory_space<vmem>>, vector<8x2xf32>,
    return
  }
  func.func @transform_0(%arg0: i32) -> (i32, i32) {
    %c0_i32 = arith.constant 0 : i32
    %c0_i32_0 = arith.constant 0 : i32
    return %arg0, %c0_i32 : i32, i32
  }
  func.func @transform_1(%arg0: i32) -> (i32, i32) {
    %c0_i32 = arith.constant 0 : i32
    %c0_i32_0 = arith.constant 0 : i32
    return %arg0, %c0_i32 : i32, i32
  }
  func.func @transform_2(%arg0: i32) -> (i32, i32) {
    %c0_i32 = arith.constant 0 : i32
    %c0_i32_0 = arith.constant 0 : i32
    %c0_i32_1 = arith.constant 0 : i32
    return %c0_i32, %c0_i32_0 : i32, i32
  }
  func.func @transform_3(%arg0: i32) -> (i32, i32) {
    %c0_i32 = arith.constant 0 : i32
    %c0_i32_0 = arith.constant 0 : i32
    %c0_i32_1 = arith.constant 0 : i32
    return %c0_i32, %c0_i32_0 : i32, i32
  }
  func.func @transform_4(%arg0: i32) -> (i32, i32) {
    %c0_i32 = arith.constant 0 : i32
    %c0_i32_0 = arith.constant 0 : i32
    %c0_i32_1 = arith.constant 0 : i32
    return %c0_i32, %c0_i32_0 : i32, i32
  }
  func.func @transform_5(%arg0: i32) -> (i32, i32) {
    %c0_i32 = arith.constant 0 : i32
    %c0_i32_0 = arith.constant 0 : i32
    %c0_i32_1 = arith.constant 0 : i32
    return %c0_i32, %c0_i32_0 : i32, i32
  }
  func.func @transform_6(%arg0: i32) -> (i32, i32) {
    %c0_i32 = arith.constant 0 : i32
    %c0_i32_0 = arith.constant 0 : i32
    %c0_i32_1 = arith.constant 0 : i32
    return %c0_i32, %c0_i32_0 : i32, i32
  }
  func.func @transform_7(%arg0: i32) -> (i32, i32) {
    %c0_i32 = arith.constant 0 : i32
    %c0_i32_0 = arith.constant 0 : i32
    return %arg0, %c0_i32 : i32, i32
  }
}

</mosaic_0001>

<bundles_post_ra>
// kernel: tpu_custom_call.1
= control target key start
LH: loop header
LB: loop body
LE: loop exit
PB: predicated region body
PF: predicated region fallthrough
CT: control target
= control target key end

     0   :  { %12 = vsyncpa [#allocation3], 0  ;;  %s3162_s24 = smov [#allocation2]   ;;  %s3524_s0 = inlined_call_operand.vmem [shape: bf16[8,1024], index: 0, kind: input, shape index: {}]   ;;  %s3525_s1 = inlined_call_operand.vmem [shape: bf16[8,20], index: 1, kind: input, shape index: {}]   ;;  %s3526_s2 = inlined_call_operand.hbm [shape: bf16[1024,512], index: 2, kind: input, shape index: {}]   ;;  %s3527_s3 = inlined_call_operand.vmem [shape: bf16[20,512], index: 3, kind: input, shape index: {}]   ;;  %s3528_s4 = inlined_call_operand.vmem [shape: f32[1,512], index: 4, kind: input, shape index: {}]   ;;  %s3529_s5 = inlined_call_operand.vmem [shape: f32[512,2], index: 5, kind: input, shape index: {}]   ;;  %s3530_s6 = inlined_call_operand.vmem [shape: f32[1,2], index: 6, kind: input, shape index: {}]   ;;  %s3531_s7 = inlined_call_operand.vmem [shape: f32[8,2], index: 7, kind: output, shape index: {}]  }
   0x1   :  { %s22_s25 = sshll.u32 %s3162_s24, 4  ;;  %s3138_s28 = scalar_lea.hbm %s3526_s2, 32768  ;;  %s23_s25 = int_to_ptr.vmem [resolvable:$true] %s22_s25 }
   0x2   :  { %p3139_p0 = scmp.ne.s32.totalorder %s3526_s2, %s3138_s28  ;;  %p3142_p1 = scmp.lt.u32.totalorder %s3138_s28, %s3526_s2 }
   0x4   :  { %p3144_p2 = pnand %p3142_p1, %p3139_p0 }
   0x6   :  { %3147 = shalt.err (!%p3144_p2)
}
   0x7   :  { %s3148_s10 = scalar_lea.vmem %s23_s25, 32768  ;;  %p3153_p4 = scmp.lt.s32.totalorder %s23_s25, %s23_s25 }
   0x8   :  { %p3149_p3 = scmp.ne.s32.totalorder %s23_s25, %s3148_s10  ;;  %p3154_p5 = scmp.lt.s32.totalorder %s3148_s10, %s3148_s10 }
   0xa   :  { %p3155_p6 = por %p3154_p5, %p3153_p4 }
   0xc   :  { %p3156_p7 = pnand %p3155_p6, %p3149_p3 }
   0xe   :  { %3159 = shalt.err (!%p3156_p7)
}
   0xf   :  { %s3163_s11 = smov 256   ;;  %s3164_s12 = smov 16  }
  0x10   :  { %28 = dma.hbm_to_vmem [thread:$0]  %s3526_s2, 32768, %s23_s25, [#allocation3], %s3163_s11, %s3163_s11, %s3164_s12  }
  0x11   :  { %3160 = dma.done.wait [#allocation3], 32768  }
  0x12   :  { %3161 = vsyncadd [#allocation3], 4294934528  ;;  %v3165_v0 = vmov 0   ;;  %v2736_v1 = vld [vmem:[%s3527_s3 + $0x4] ss:$16 sps:$4 sm:$0xff]   ;;  %vm342_vm0 = vcmask 1041408  }
  0x13   :  { %387 = vmatprep.mubr.bf16.mxu0 %v3165_v0  ;;  %428 = vmatprep.mubr.bf16.mxu1 %v3165_v0  ;;  %v2738_v2 = vld [vmem:[%s3527_s3 + $0xc] ss:$16 sps:$4 sm:$0xff]   ;;  %v2740_v3 = vld [vmem:[%s3527_s3] ss:$16 sps:$4 sm:$0xff]   ;;  %v2741_v4 = vld [vmem:[%s3527_s3 + $0x8] ss:$16 sps:$4 sm:$0xff]  }
  0x14   :  { %355 = vmatprep.subr.bf16.mxu0 %v2736_v1  ;;  %v306_v5 = vld [vmem:[%s3527_s3 + $0x20] sm:$0x33]  ;;  %396 = vmatprep.subr.bf16.mxu1 %v2738_v2  ;;  %v307_v7 = vld [vmem:[%s3527_s3 + $0x28] sm:$0x33]  ;;  %vm338_vm1 = vcmask 162816   ;;  %vm2314_vm2 = vcmask 15360  }
  0x15   :  { %v2326_v6 = vcombine.high %v306_v5, %v306_v5  ;;  %v2325_v8 = vcombine.low %v306_v5, %v306_v5  ;;  %356 = vmatpush1.bf16.msra.mxu0 %v2740_v3  ;;  %397 = vmatpush1.bf16.msra.mxu1 %v2741_v4  ;;  %v2328_v9 = vcombine.high %v307_v7, %v307_v7  ;;  %v2748_v12 = vld [vmem:[#allocation2 + $0x4] ss:$16 sps:$4 sm:$0xff]   ;;  %v301_v15 = vld [vmem:[%s3525_s1] sm:$0xf]  ;;  %v42_v57 = vld [vmem:[%s3524_s0 + $0x8] sm:$0xff] }
  0x16   :  { %v2327_v10 = vcombine.low %v307_v7, %v307_v7  ;;  %v2751_v14 = vld [vmem:[#allocation2 + $0x204] ss:$16 sps:$4 sm:$0xff]   ;;  %v2746_v16 = vld [vmem:[#allocation2] ss:$16 sps:$4 sm:$0xff]   ;;  %v3251_v60 = vcombine.high %v42_v57, %v42_v57 }
  0x17   :  { %2329 = vmatprep.subr.msk.bf16.mxu0 %vm342_vm0, %v2326_v6  ;;  %v344_v11 = vsel %vm342_vm0, %v2325_v8, 0  ;;  %2331 = vmatprep.subr.msk.bf16.mxu1 %vm342_vm0, %v2328_v9  ;;  %v2749_v17 = vld [vmem:[#allocation2 + $0x200] ss:$16 sps:$4 sm:$0xff]   ;;  %v2754_v18 = vld [vmem:[#allocation2 + $0x24] ss:$16 sps:$4 sm:$0xff]  }
  0x18   :  { %v350_v13 = vsel %vm342_vm0, %v2327_v10, 0  ;;  %v2757_v19 = vld [vmem:[#allocation2 + $0x224] ss:$16 sps:$4 sm:$0xff]   ;;  %v2752_v20 = vld [vmem:[#allocation2 + $0x20] ss:$16 sps:$4 sm:$0xff]  }
  0x19   :  { %358 = vmatpush1.bf16.msra.mxu0 %v344_v11  ;;  %399 = vmatpush1.bf16.msra.mxu1 %v350_v13  ;;  %v2755_v21 = vld [vmem:[#allocation2 + $0x220] ss:$16 sps:$4 sm:$0xff]   ;;  %v2760_v22 = vld [vmem:[#allocation2 + $0x44] ss:$16 sps:$4 sm:$0xff]  }
  0x1a   :  { %1745 = vmatprep.subr.bf16.mxu0 %v2748_v12  ;;  %1786 = vmatprep.subr.bf16.mxu1 %v2751_v14  ;;  %v2763_v23 = vld [vmem:[#allocation2 + $0x244] ss:$16 sps:$4 sm:$0xff]   ;;  %v2758_v24 = vld [vmem:[#allocation2 + $0x40] ss:$16 sps:$4 sm:$0xff]  }
  0x1b   :  { %v2761_v25 = vld [vmem:[#allocation2 + $0x240] ss:$16 sps:$4 sm:$0xff]   ;;  %v2766_v26 = vld [vmem:[#allocation2 + $0x64] ss:$16 sps:$4 sm:$0xff]  }
  0x1c   :  { %2330 = vmatmul.mubr.msk.bf16.vlgmr.msra.gmra.mrb[0].mxu0 %vm338_vm1, %v301_v15  ;;  %2332 = vmatmul.mubr.msk.bf16.vlgmr.msra.gmra.mrb[0].mxu1 %vm338_vm1, %v301_v15  ;;  %v2769_v27 = vld [vmem:[#allocation2 + $0x264] ss:$16 sps:$4 sm:$0xff]   ;;  %v2764_v28 = vld [vmem:[#allocation2 + $0x60] ss:$16 sps:$4 sm:$0xff]  }
  0x1d   :  { %1746 = vmatpush1.bf16.msra.mxu0 %v2746_v16  ;;  %1787 = vmatpush1.bf16.msra.mxu1 %v2749_v17  ;;  %v2767_v29 = vld [vmem:[#allocation2 + $0x260] ss:$16 sps:$4 sm:$0xff]   ;;  %v2772_v30 = vld [vmem:[#allocation2 + $0x84] ss:$16 sps:$4 sm:$0xff]  }
  0x1e   :  { %1747 = vmatprep.subr.bf16.mxu0 %v2754_v18  ;;  %1788 = vmatprep.subr.bf16.mxu1 %v2757_v19  ;;  %v2775_v31 = vld [vmem:[#allocation2 + $0x284] ss:$16 sps:$4 sm:$0xff]   ;;  %v2770_v32 = vld [vmem:[#allocation2 + $0x80] ss:$16 sps:$4 sm:$0xff]  }
  0x1f   :  { %v2773_v33 = vld [vmem:[#allocation2 + $0x280] ss:$16 sps:$4 sm:$0xff]   ;;  %v2778_v34 = vld [vmem:[#allocation2 + $0xa4] ss:$16 sps:$4 sm:$0xff]   ;;  %1818 = vmatprep.mubr.bf16.mxu1 %v3251_v60 }
  0x20   :  { %v2781_v35 = vld [vmem:[#allocation2 + $0x2a4] ss:$16 sps:$4 sm:$0xff]   ;;  %v2776_v36 = vld [vmem:[#allocation2 + $0xa0] ss:$16 sps:$4 sm:$0xff]  }
  0x21   :  { %1748 = vmatpush1.bf16.msra.mxu0 %v2752_v20  ;;  %1789 = vmatpush1.bf16.msra.mxu1 %v2755_v21  ;;  %v2779_v37 = vld [vmem:[#allocation2 + $0x2a0] ss:$16 sps:$4 sm:$0xff]   ;;  %v2784_v38 = vld [vmem:[#allocation2 + $0xc4] ss:$16 sps:$4 sm:$0xff]   ;;  %v3257_v21 = vcombine.low %v42_v57, %v42_v57 }
  0x22   :  { %1749 = vmatprep.subr.bf16.mxu0 %v2760_v22  ;;  %1790 = vmatprep.subr.bf16.mxu1 %v2763_v23  ;;  %v2787_v39 = vld [vmem:[#allocation2 + $0x2c4] ss:$16 sps:$4 sm:$0xff]   ;;  %v2782_v40 = vld [vmem:[#allocation2 + $0xc0] ss:$16 sps:$4 sm:$0xff]  }
  0x23   :  { %v2785_v41 = vld [vmem:[#allocation2 + $0x2c0] ss:$16 sps:$4 sm:$0xff]   ;;  %v2790_v42 = vld [vmem:[#allocation2 + $0xe4] ss:$16 sps:$4 sm:$0xff]  }
  0x24   :  { %v2793_v43 = vld [vmem:[#allocation2 + $0x2e4] ss:$16 sps:$4 sm:$0xff]   ;;  %v2788_v44 = vld [vmem:[#allocation2 + $0xe0] ss:$16 sps:$4 sm:$0xff]  }
  0x25   :  { %1750 = vmatpush1.bf16.msra.mxu0 %v2758_v24  ;;  %1791 = vmatpush1.bf16.msra.mxu1 %v2761_v25  ;;  %v2791_v45 = vld [vmem:[#allocation2 + $0x2e0] ss:$16 sps:$4 sm:$0xff]   ;;  %v2796_v46 = vld [vmem:[#allocation2 + $0x104] ss:$16 sps:$4 sm:$0xff]  }
  0x26   :  { %1751 = vmatprep.subr.bf16.mxu0 %v2766_v26  ;;  %1792 = vmatprep.subr.bf16.mxu1 %v2769_v27  ;;  %v2799_v47 = vld [vmem:[#allocation2 + $0x304] ss:$16 sps:$4 sm:$0xff]   ;;  %v2794_v48 = vld [vmem:[#allocation2 + $0x100] ss:$16 sps:$4 sm:$0xff]  }
  0x27   :  { %v2797_v49 = vld [vmem:[#allocation2 + $0x300] ss:$16 sps:$4 sm:$0xff]   ;;  %v2802_v50 = vld [vmem:[#allocation2 + $0x124] ss:$16 sps:$4 sm:$0xff]  }
  0x28   :  { %v2805_v51 = vld [vmem:[#allocation2 + $0x324] ss:$16 sps:$4 sm:$0xff]   ;;  %v2800_v52 = vld [vmem:[#allocation2 + $0x120] ss:$16 sps:$4 sm:$0xff]  }
  0x29   :  { %1752 = vmatpush1.bf16.msra.mxu0 %v2764_v28  ;;  %1793 = vmatpush1.bf16.msra.mxu1 %v2767_v29  ;;  %v2803_v53 = vld [vmem:[#allocation2 + $0x320] ss:$16 sps:$4 sm:$0xff]   ;;  %v2808_v54 = vld [vmem:[#allocation2 + $0x144] ss:$16 sps:$4 sm:$0xff]  }
  0x2a   :  { %1753 = vmatprep.subr.bf16.mxu0 %v2772_v30  ;;  %1794 = vmatprep.subr.bf16.mxu1 %v2775_v31  ;;  %v2811_v55 = vld [vmem:[#allocation2 + $0x344] ss:$16 sps:$4 sm:$0xff]   ;;  %v2806_v58 = vld [vmem:[#allocation2 + $0x140] ss:$16 sps:$4 sm:$0xff]  }
  0x2b   :  { %v41_v56 = vld [vmem:[%s3524_s0] sm:$0xff] }
  0x2c   :  { %v3249_v59 = vcombine.high %v41_v56, %v41_v56  ;;  %v2809_v61 = vld [vmem:[#allocation2 + $0x340] ss:$16 sps:$4 sm:$0xff]   ;;  %v2814_v62 = vld [vmem:[#allocation2 + $0x164] ss:$16 sps:$4 sm:$0xff]   ;;  %v3255_v20 = vcombine.low %v41_v56, %v41_v56 }
  0x2d   :  { %1754 = vmatpush1.bf16.msra.mxu0 %v2770_v32  ;;  %1795 = vmatpush1.bf16.msra.mxu1 %v2773_v33  ;;  %v2817_v63 = vld [vmem:[#allocation2 + $0x364] ss:$16 sps:$4 sm:$0xff]   ;;  %v2812_v0 = vld [vmem:[#allocation2 + $0x160] ss:$16 sps:$4 sm:$0xff]  }
  0x2e   :  { %1755 = vmatprep.subr.bf16.mxu0 %v2778_v34  ;;  %1796 = vmatprep.subr.bf16.mxu1 %v2781_v35  ;;  %v2815_v1 = vld [vmem:[#allocation2 + $0x360] ss:$16 sps:$4 sm:$0xff]   ;;  %v2820_v2 = vld [vmem:[#allocation2 + $0x184] ss:$16 sps:$4 sm:$0xff]  }
  0x2f   :  { %1777 = vmatprep.mubr.bf16.mxu0 %v3249_v59  ;;  %v2823_v3 = vld [vmem:[#allocation2 + $0x384] ss:$16 sps:$4 sm:$0xff]   ;;  %v2818_v4 = vld [vmem:[#allocation2 + $0x180] ss:$16 sps:$4 sm:$0xff]  }
  0x30   :  { %v2821_v5 = vld [vmem:[#allocation2 + $0x380] ss:$16 sps:$4 sm:$0xff]   ;;  %v2826_v6 = vld [vmem:[#allocation2 + $0x1a4] ss:$16 sps:$4 sm:$0xff]  }
  0x31   :  { %1756 = vmatpush1.bf16.msra.mxu0 %v2776_v36  ;;  %1797 = vmatpush1.bf16.msra.mxu1 %v2779_v37  ;;  %v2829_v7 = vld [vmem:[#allocation2 + $0x3a4] ss:$16 sps:$4 sm:$0xff]   ;;  %v2824_v8 = vld [vmem:[#allocation2 + $0x1a0] ss:$16 sps:$4 sm:$0xff]  }
  0x32   :  { %1757 = vmatprep.subr.bf16.mxu0 %v2784_v38  ;;  %1798 = vmatprep.subr.bf16.mxu1 %v2787_v39  ;;  %v2827_v9 = vld [vmem:[#allocation2 + $0x3a0] ss:$16 sps:$4 sm:$0xff]   ;;  %v2832_v10 = vld [vmem:[#allocation2 + $0x1c4] ss:$16 sps:$4 sm:$0xff]  }
  0x33   :  { %v2835_v11 = vld [vmem:[#allocation2 + $0x3c4] ss:$16 sps:$4 sm:$0xff]   ;;  %v2830_v12 = vld [vmem:[#allocation2 + $0x1c0] ss:$16 sps:$4 sm:$0xff]  }
  0x34   :  { %v2833_v13 = vld [vmem:[#allocation2 + $0x3c0] ss:$16 sps:$4 sm:$0xff]   ;;  %v2838_v14 = vld [vmem:[#allocation2 + $0x1e4] ss:$16 sps:$4 sm:$0xff]  }
  0x35   :  { %1758 = vmatpush1.bf16.msra.mxu0 %v2782_v40  ;;  %1799 = vmatpush1.bf16.msra.mxu1 %v2785_v41  ;;  %v2841_v15 = vld [vmem:[#allocation2 + $0x3e4] ss:$16 sps:$4 sm:$0xff]   ;;  %v2836_v16 = vld [vmem:[#allocation2 + $0x1e0] ss:$16 sps:$4 sm:$0xff]  }
  0x36   :  { %1759 = vmatprep.subr.bf16.mxu0 %v2790_v42  ;;  %1800 = vmatprep.subr.bf16.mxu1 %v2793_v43  ;;  %v2839_v17 = vld [vmem:[#allocation2 + $0x3e0] ss:$16 sps:$4 sm:$0xff]   ;;  %v2848_v18 = vld [vmem:[#allocation2 + $0x404] ss:$16 sps:$4 sm:$0xff]  }
  0x37   :  { %v2851_v19 = vld [vmem:[#allocation2 + $0x604] ss:$16 sps:$4 sm:$0xff]   ;;  %v2846_v22 = vld [vmem:[#allocation2 + $0x400] ss:$16 sps:$4 sm:$0xff]  }
  0x38   :  { %v2849_v23 = vld [vmem:[#allocation2 + $0x600] ss:$16 sps:$4 sm:$0xff]   ;;  %v2854_v24 = vld [vmem:[#allocation2 + $0x424] ss:$16 sps:$4 sm:$0xff]  }
  0x39   :  { %1760 = vmatpush1.bf16.msra.mxu0 %v2788_v44  ;;  %1801 = vmatpush1.bf16.msra.mxu1 %v2791_v45  ;;  %v2857_v25 = vld [vmem:[#allocation2 + $0x624] ss:$16 sps:$4 sm:$0xff]   ;;  %v2852_v26 = vld [vmem:[#allocation2 + $0x420] ss:$16 sps:$4 sm:$0xff]   ;;  %v3273_v44 = vld [vmem:[%s3524_s0 + $0x18] sm:$0xff] }
  0x3a   :  { %1761 = vmatprep.subr.bf16.mxu0 %v2796_v46  ;;  %1802 = vmatprep.subr.bf16.mxu1 %v2799_v47  ;;  %v2855_v27 = vld [vmem:[#allocation2 + $0x620] ss:$16 sps:$4 sm:$0xff]   ;;  %v2860_v28 = vld [vmem:[#allocation2 + $0x444] ss:$16 sps:$4 sm:$0xff]   ;;  %v3277_v46 = vcombine.high %v3273_v44, %v3273_v44 }
  0x3b   :  { %v2863_v29 = vld [vmem:[#allocation2 + $0x644] ss:$16 sps:$4 sm:$0xff]   ;;  %v2858_v30 = vld [vmem:[#allocation2 + $0x440] ss:$16 sps:$4 sm:$0xff]  }
  0x3c   :  { %v2861_v31 = vld [vmem:[#allocation2 + $0x640] ss:$16 sps:$4 sm:$0xff]   ;;  %v2866_v32 = vld [vmem:[#allocation2 + $0x464] ss:$16 sps:$4 sm:$0xff]  }
  0x3d   :  { %1762 = vmatpush1.bf16.msra.mxu0 %v2794_v48  ;;  %1803 = vmatpush1.bf16.msra.mxu1 %v2797_v49  ;;  %v2869_v33 = vld [vmem:[#allocation2 + $0x664] ss:$16 sps:$4 sm:$0xff]   ;;  %v2864_v34 = vld [vmem:[#allocation2 + $0x460] ss:$16 sps:$4 sm:$0xff]  }
  0x3e   :  { %1763 = vmatprep.subr.bf16.mxu0 %v2802_v50  ;;  %1804 = vmatprep.subr.bf16.mxu1 %v2805_v51  ;;  %v2867_v35 = vld [vmem:[#allocation2 + $0x660] ss:$16 sps:$4 sm:$0xff]   ;;  %v2872_v36 = vld [vmem:[#allocation2 + $0x484] ss:$16 sps:$4 sm:$0xff]  }
  0x3f   :  { %v2875_v37 = vld [vmem:[#allocation2 + $0x684] ss:$16 sps:$4 sm:$0xff]   ;;  %v2870_v38 = vld [vmem:[#allocation2 + $0x480] ss:$16 sps:$4 sm:$0xff]  }
  0x40   :  { %v2873_v39 = vld [vmem:[#allocation2 + $0x680] ss:$16 sps:$4 sm:$0xff]   ;;  %v2878_v40 = vld [vmem:[#allocation2 + $0x4a4] ss:$16 sps:$4 sm:$0xff]  }
  0x41   :  { %1764 = vmatpush1.bf16.msra.mxu0 %v2800_v52  ;;  %1805 = vmatpush1.bf16.msra.mxu1 %v2803_v53  ;;  %v2881_v41 = vld [vmem:[#allocation2 + $0x6a4] ss:$16 sps:$4 sm:$0xff]   ;;  %v2876_v45 = vld [vmem:[#allocation2 + $0x4a0] ss:$16 sps:$4 sm:$0xff]  }
  0x42   :  { %1765 = vmatprep.subr.bf16.mxu0 %v2808_v54  ;;  %1806 = vmatprep.subr.bf16.mxu1 %v2811_v55  ;;  %v3264_v42 = vld [vmem:[%s3524_s0 + $0x10] sm:$0xff] }
  0x43   :  { %v3268_v43 = vcombine.high %v3264_v42, %v3264_v42  ;;  %v2879_v47 = vld [vmem:[#allocation2 + $0x6a0] ss:$16 sps:$4 sm:$0xff]   ;;  %v2884_v48 = vld [vmem:[#allocation2 + $0x4c4] ss:$16 sps:$4 sm:$0xff]  }
  0x44   :  { %v2887_v49 = vld [vmem:[#allocation2 + $0x6c4] ss:$16 sps:$4 sm:$0xff]   ;;  %v2882_v50 = vld [vmem:[#allocation2 + $0x4c0] ss:$16 sps:$4 sm:$0xff]  }
  0x45   :  { %1766 = vmatpush1.bf16.msra.mxu0 %v2806_v58  ;;  %1807 = vmatpush1.bf16.msra.mxu1 %v2809_v61  ;;  %v2885_v51 = vld [vmem:[#allocation2 + $0x6c0] ss:$16 sps:$4 sm:$0xff]   ;;  %v2890_v52 = vld [vmem:[#allocation2 + $0x4e4] ss:$16 sps:$4 sm:$0xff]  }
  0x46   :  { %1767 = vmatprep.subr.bf16.mxu0 %v2814_v62  ;;  %1808 = vmatprep.subr.bf16.mxu1 %v2817_v63  ;;  %v2893_v53 = vld [vmem:[#allocation2 + $0x6e4] ss:$16 sps:$4 sm:$0xff]   ;;  %v2888_v54 = vld [vmem:[#allocation2 + $0x4e0] ss:$16 sps:$4 sm:$0xff]  }
  0x47   :  { %v2891_v55 = vld [vmem:[#allocation2 + $0x6e0] ss:$16 sps:$4 sm:$0xff]   ;;  %v2896_v56 = vld [vmem:[#allocation2 + $0x504] ss:$16 sps:$4 sm:$0xff]  }
  0x48   :  { %v2899_v57 = vld [vmem:[#allocation2 + $0x704] ss:$16 sps:$4 sm:$0xff]   ;;  %v2894_v58 = vld [vmem:[#allocation2 + $0x500] ss:$16 sps:$4 sm:$0xff]  }
  0x49   :  { %1768 = vmatpush1.bf16.msra.mxu0 %v2812_v0  ;;  %1809 = vmatpush1.bf16.msra.mxu1 %v2815_v1  ;;  %v2897_v61 = vld [vmem:[#allocation2 + $0x700] ss:$16 sps:$4 sm:$0xff]   ;;  %v2902_v62 = vld [vmem:[#allocation2 + $0x524] ss:$16 sps:$4 sm:$0xff]  }
  0x4a   :  { %1769 = vmatprep.subr.bf16.mxu0 %v2820_v2  ;;  %1810 = vmatprep.subr.bf16.mxu1 %v2823_v3  ;;  %v2905_v63 = vld [vmem:[#allocation2 + $0x724] ss:$16 sps:$4 sm:$0xff]   ;;  %v2900_v0 = vld [vmem:[#allocation2 + $0x520] ss:$16 sps:$4 sm:$0xff]  }
  0x4b   :  { %v2903_v1 = vld [vmem:[#allocation2 + $0x720] ss:$16 sps:$4 sm:$0xff]   ;;  %v2908_v2 = vld [vmem:[#allocation2 + $0x544] ss:$16 sps:$4 sm:$0xff]  }
  0x4c   :  { %v2911_v3 = vld [vmem:[#allocation2 + $0x744] ss:$16 sps:$4 sm:$0xff]  }
  0x4d   :  { %1770 = vmatpush1.bf16.msra.mxu0 %v2818_v4  ;;  %1811 = vmatpush1.bf16.msra.mxu1 %v2821_v5  ;;  %v2906_v4 = vld [vmem:[#allocation2 + $0x540] ss:$16 sps:$4 sm:$0xff]  }
  0x4e   :  { %1771 = vmatprep.subr.bf16.mxu0 %v2826_v6  ;;  %1812 = vmatprep.subr.bf16.mxu1 %v2829_v7  ;;  %v2909_v5 = vld [vmem:[#allocation2 + $0x740] ss:$16 sps:$4 sm:$0xff]   ;;  %v2914_v6 = vld [vmem:[#allocation2 + $0x564] ss:$16 sps:$4 sm:$0xff]  }
  0x4f   :  { %v2917_v7 = vld [vmem:[#allocation2 + $0x764] ss:$16 sps:$4 sm:$0xff]  }
  0x51   :  { %1772 = vmatpush1.bf16.msra.mxu0 %v2824_v8  ;;  %1813 = vmatpush1.bf16.msra.mxu1 %v2827_v9  ;;  %v2912_v8 = vld [vmem:[#allocation2 + $0x560] ss:$16 sps:$4 sm:$0xff]  }
  0x52   :  { %1773 = vmatprep.subr.bf16.mxu0 %v2832_v10  ;;  %1814 = vmatprep.subr.bf16.mxu1 %v2835_v11  ;;  %v2915_v9 = vld [vmem:[#allocation2 + $0x760] ss:$16 sps:$4 sm:$0xff]   ;;  %v2920_v10 = vld [vmem:[#allocation2 + $0x584] ss:$16 sps:$4 sm:$0xff]  }
  0x53   :  { %v2923_v11 = vld [vmem:[#allocation2 + $0x784] ss:$16 sps:$4 sm:$0xff]  }
  0x55   :  { %1774 = vmatpush1.bf16.msra.mxu0 %v2830_v12  ;;  %1815 = vmatpush1.bf16.msra.mxu1 %v2833_v13  ;;  %v2918_v12 = vld [vmem:[#allocation2 + $0x580] ss:$16 sps:$4 sm:$0xff]  }
  0x56   :  { %1775 = vmatprep.subr.bf16.mxu0 %v2838_v14  ;;  %1816 = vmatprep.subr.bf16.mxu1 %v2841_v15  ;;  %v2921_v13 = vld [vmem:[#allocation2 + $0x780] ss:$16 sps:$4 sm:$0xff]   ;;  %v2926_v14 = vld [vmem:[#allocation2 + $0x5a4] ss:$16 sps:$4 sm:$0xff]  }
  0x57   :  { %v2929_v15 = vld [vmem:[#allocation2 + $0x7a4] ss:$16 sps:$4 sm:$0xff]  }
  0x59   :  { %1776 = vmatpush1.bf16.msra.mxu0 %v2836_v16  ;;  %1817 = vmatpush1.bf16.msra.mxu1 %v2839_v17  ;;  %v2924_v16 = vld [vmem:[#allocation2 + $0x5a0] ss:$16 sps:$4 sm:$0xff]  }
  0x5a   :  { %1827 = vmatprep.subr.bf16.mxu0 %v2848_v18  ;;  %1868 = vmatprep.subr.bf16.mxu1 %v2851_v19  ;;  %v2927_v17 = vld [vmem:[#allocation2 + $0x7a0] ss:$16 sps:$4 sm:$0xff]   ;;  %v2932_v18 = vld [vmem:[#allocation2 + $0x5c4] ss:$16 sps:$4 sm:$0xff]  }
  0x5b   :  { %v2935_v19 = vld [vmem:[#allocation2 + $0x7c4] ss:$16 sps:$4 sm:$0xff]  }
  0x5c   :  { %1778 = vmatmul.mubr.bf16.vlgmr.msra.gmra.mrb[4].mxu0 %v3255_v20  ;;  %1819 = vmatmul.mubr.bf16.vlgmr.msra.gmra.mrb[4].mxu1 %v3257_v21 }
  0x5d   :  { %1828 = vmatpush1.bf16.msra.mxu0 %v2846_v22  ;;  %1869 = vmatpush1.bf16.msra.mxu1 %v2849_v23  ;;  %v2930_v22 = vld [vmem:[#allocation2 + $0x5c0] ss:$16 sps:$4 sm:$0xff]  }
  0x5e   :  { %1829 = vmatprep.subr.bf16.mxu0 %v2854_v24  ;;  %1870 = vmatprep.subr.bf16.mxu1 %v2857_v25  ;;  %v2933_v23 = vld [vmem:[#allocation2 + $0x7c0] ss:$16 sps:$4 sm:$0xff]   ;;  %v2938_v24 = vld [vmem:[#allocation2 + $0x5e4] ss:$16 sps:$4 sm:$0xff]  }
  0x5f   :  { %1859 = vmatprep.mubr.bf16.mxu0 %v3268_v43  ;;  %1900 = vmatprep.mubr.bf16.mxu1 %v3277_v46  ;;  %v2941_v25 = vld [vmem:[#allocation2 + $0x7e4] ss:$16 sps:$4 sm:$0xff]  }
  0x61   :  { %1830 = vmatpush1.bf16.msra.mxu0 %v2852_v26  ;;  %1871 = vmatpush1.bf16.msra.mxu1 %v2855_v27  ;;  %v2936_v26 = vld [vmem:[#allocation2 + $0x5e0] ss:$16 sps:$4 sm:$0xff]  }
  0x62   :  { %1831 = vmatprep.subr.bf16.mxu0 %v2860_v28  ;;  %1872 = vmatprep.subr.bf16.mxu1 %v2863_v29  ;;  %v2939_v27 = vld [vmem:[#allocation2 + $0x7e0] ss:$16 sps:$4 sm:$0xff]   ;;  %v2948_v28 = vld [vmem:[#allocation2 + $0xc] ss:$16 sps:$4 sm:$0xff]  }
  0x63   :  { %v2951_v29 = vld [vmem:[#allocation2 + $0x20c] ss:$16 sps:$4 sm:$0xff]  }
  0x65   :  { %1832 = vmatpush1.bf16.msra.mxu0 %v2858_v30  ;;  %1873 = vmatpush1.bf16.msra.mxu1 %v2861_v31  ;;  %v3283_v30 = vcombine.low %v3264_v42, %v3264_v42  ;;  %v3287_v31 = vcombine.low %v3273_v44, %v3273_v44  ;;  %v2966_v42 = vld [vmem:[#allocation2 + $0x6c] ss:$16 sps:$4 sm:$0xff]  }
  0x66   :  { %1833 = vmatprep.subr.bf16.mxu0 %v2866_v32  ;;  %1874 = vmatprep.subr.bf16.mxu1 %v2869_v33  ;;  %v2946_v32 = vld [vmem:[#allocation2 + $0x8] ss:$16 sps:$4 sm:$0xff]   ;;  %v2969_v44 = vld [vmem:[#allocation2 + $0x26c] ss:$16 sps:$4 sm:$0xff]  }
  0x67   :  { %v2949_v33 = vld [vmem:[#allocation2 + $0x208] ss:$16 sps:$4 sm:$0xff]  }
  0x69   :  { %1834 = vmatpush1.bf16.msra.mxu0 %v2864_v34  ;;  %1875 = vmatpush1.bf16.msra.mxu1 %v2867_v35  ;;  %v2954_v34 = vld [vmem:[#allocation2 + $0x2c] ss:$16 sps:$4 sm:$0xff]  }
  0x6a   :  { %1835 = vmatprep.subr.bf16.mxu0 %v2872_v36  ;;  %1876 = vmatprep.subr.bf16.mxu1 %v2875_v37  ;;  %v2957_v35 = vld [vmem:[#allocation2 + $0x22c] ss:$16 sps:$4 sm:$0xff]   ;;  %v2952_v36 = vld [vmem:[#allocation2 + $0x28] ss:$16 sps:$4 sm:$0xff]  }
  0x6b   :  { %v2955_v37 = vld [vmem:[#allocation2 + $0x228] ss:$16 sps:$4 sm:$0xff]  }
  0x6d   :  { %1836 = vmatpush1.bf16.msra.mxu0 %v2870_v38  ;;  %1877 = vmatpush1.bf16.msra.mxu1 %v2873_v39  ;;  %v2960_v38 = vld [vmem:[#allocation2 + $0x4c] ss:$16 sps:$4 sm:$0xff]  }
  0x6e   :  { %1837 = vmatprep.subr.bf16.mxu0 %v2878_v40  ;;  %1878 = vmatprep.subr.bf16.mxu1 %v2881_v41  ;;  %v2963_v39 = vld [vmem:[#allocation2 + $0x24c] ss:$16 sps:$4 sm:$0xff]   ;;  %v2958_v40 = vld [vmem:[#allocation2 + $0x48] ss:$16 sps:$4 sm:$0xff]  }
  0x6f   :  { %v2961_v41 = vld [vmem:[#allocation2 + $0x248] ss:$16 sps:$4 sm:$0xff]  }
  0x71   :  { %1838 = vmatpush1.bf16.msra.mxu0 %v2876_v45  ;;  %1879 = vmatpush1.bf16.msra.mxu1 %v2879_v47  ;;  %v2964_v45 = vld [vmem:[#allocation2 + $0x68] ss:$16 sps:$4 sm:$0xff]  }
  0x72   :  { %1839 = vmatprep.subr.bf16.mxu0 %v2884_v48  ;;  %1880 = vmatprep.subr.bf16.mxu1 %v2887_v49  ;;  %v2967_v47 = vld [vmem:[#allocation2 + $0x268] ss:$16 sps:$4 sm:$0xff]   ;;  %v2972_v48 = vld [vmem:[#allocation2 + $0x8c] ss:$16 sps:$4 sm:$0xff]  }
  0x73   :  { %v2975_v49 = vld [vmem:[#allocation2 + $0x28c] ss:$16 sps:$4 sm:$0xff]  }
  0x75   :  { %1840 = vmatpush1.bf16.msra.mxu0 %v2882_v50  ;;  %1881 = vmatpush1.bf16.msra.mxu1 %v2885_v51  ;;  %v2970_v50 = vld [vmem:[#allocation2 + $0x88] ss:$16 sps:$4 sm:$0xff]   ;;  %v2981_v51 = vld [vmem:[#allocation2 + $0x2ac] ss:$16 sps:$4 sm:$0xff]  }
  0x76   :  { %1841 = vmatprep.subr.bf16.mxu0 %v2890_v52  ;;  %1882 = vmatprep.subr.bf16.mxu1 %v2893_v53  ;;  %v2976_v52 = vld [vmem:[#allocation2 + $0xa8] ss:$16 sps:$4 sm:$0xff]  }
  0x77   :  { %v2979_v53 = vld [vmem:[#allocation2 + $0x2a8] ss:$16 sps:$4 sm:$0xff]  }
  0x79   :  { %1842 = vmatpush1.bf16.msra.mxu0 %v2888_v54  ;;  %1883 = vmatpush1.bf16.msra.mxu1 %v2891_v55  ;;  %v2984_v54 = vld [vmem:[#allocation2 + $0xcc] ss:$16 sps:$4 sm:$0xff]  }
  0x7a   :  { %1843 = vmatprep.subr.bf16.mxu0 %v2896_v56  ;;  %1884 = vmatprep.subr.bf16.mxu1 %v2899_v57  ;;  %v2987_v55 = vld [vmem:[#allocation2 + $0x2cc] ss:$16 sps:$4 sm:$0xff]   ;;  %v2982_v56 = vld [vmem:[#allocation2 + $0xc8] ss:$16 sps:$4 sm:$0xff]  }
  0x7b   :  { %v2985_v57 = vld [vmem:[#allocation2 + $0x2c8] ss:$16 sps:$4 sm:$0xff]  }
  0x7d   :  { %1844 = vmatpush1.bf16.msra.mxu0 %v2894_v58  ;;  %1885 = vmatpush1.bf16.msra.mxu1 %v2897_v61  ;;  %v2990_v58 = vld [vmem:[#allocation2 + $0xec] ss:$16 sps:$4 sm:$0xff]  }
  0x7e   :  { %1845 = vmatprep.subr.bf16.mxu0 %v2902_v62  ;;  %1886 = vmatprep.subr.bf16.mxu1 %v2905_v63  ;;  %v2993_v61 = vld [vmem:[#allocation2 + $0x2ec] ss:$16 sps:$4 sm:$0xff]   ;;  %v2988_v62 = vld [vmem:[#allocation2 + $0xe8] ss:$16 sps:$4 sm:$0xff]  }
  0x7f   :  { %v2991_v63 = vld [vmem:[#allocation2 + $0x2e8] ss:$16 sps:$4 sm:$0xff]  }
  0x81   :  { %1846 = vmatpush1.bf16.msra.mxu0 %v2900_v0  ;;  %1887 = vmatpush1.bf16.msra.mxu1 %v2903_v1  ;;  %v2996_v0 = vld [vmem:[#allocation2 + $0x10c] ss:$16 sps:$4 sm:$0xff]  }
  0x82   :  { %1847 = vmatprep.subr.bf16.mxu0 %v2908_v2  ;;  %1888 = vmatprep.subr.bf16.mxu1 %v2911_v3  ;;  %v2999_v1 = vld [vmem:[#allocation2 + $0x30c] ss:$16 sps:$4 sm:$0xff]   ;;  %v2994_v2 = vld [vmem:[#allocation2 + $0x108] ss:$16 sps:$4 sm:$0xff]  }
  0x83   :  { %v2997_v3 = vld [vmem:[#allocation2 + $0x308] ss:$16 sps:$4 sm:$0xff]  }
  0x85   :  { %1848 = vmatpush1.bf16.msra.mxu0 %v2906_v4  ;;  %1889 = vmatpush1.bf16.msra.mxu1 %v2909_v5  ;;  %v3002_v4 = vld [vmem:[#allocation2 + $0x12c] ss:$16 sps:$4 sm:$0xff]  }
  0x86   :  { %1849 = vmatprep.subr.bf16.mxu0 %v2914_v6  ;;  %1890 = vmatprep.subr.bf16.mxu1 %v2917_v7  ;;  %v3005_v5 = vld [vmem:[#allocation2 + $0x32c] ss:$16 sps:$4 sm:$0xff]   ;;  %v3000_v6 = vld [vmem:[#allocation2 + $0x128] ss:$16 sps:$4 sm:$0xff]  }
  0x87   :  { %v3003_v7 = vld [vmem:[#allocation2 + $0x328] ss:$16 sps:$4 sm:$0xff]  }
  0x89   :  { %1850 = vmatpush1.bf16.msra.mxu0 %v2912_v8  ;;  %1891 = vmatpush1.bf16.msra.mxu1 %v2915_v9  ;;  %v3008_v8 = vld [vmem:[#allocation2 + $0x14c] ss:$16 sps:$4 sm:$0xff]  }
  0x8a   :  { %1851 = vmatprep.subr.bf16.mxu0 %v2920_v10  ;;  %1892 = vmatprep.subr.bf16.mxu1 %v2923_v11  ;;  %v3011_v9 = vld [vmem:[#allocation2 + $0x34c] ss:$16 sps:$4 sm:$0xff]   ;;  %v3006_v10 = vld [vmem:[#allocation2 + $0x148] ss:$16 sps:$4 sm:$0xff]  }
  0x8b   :  { %v3009_v11 = vld [vmem:[#allocation2 + $0x348] ss:$16 sps:$4 sm:$0xff]  }
  0x8d   :  { %1852 = vmatpush1.bf16.msra.mxu0 %v2918_v12  ;;  %1893 = vmatpush1.bf16.msra.mxu1 %v2921_v13  ;;  %v3014_v12 = vld [vmem:[#allocation2 + $0x16c] ss:$16 sps:$4 sm:$0xff]  }
  0x8e   :  { %1853 = vmatprep.subr.bf16.mxu0 %v2926_v14  ;;  %1894 = vmatprep.subr.bf16.mxu1 %v2929_v15  ;;  %v3017_v13 = vld [vmem:[#allocation2 + $0x36c] ss:$16 sps:$4 sm:$0xff]   ;;  %v3012_v14 = vld [vmem:[#allocation2 + $0x168] ss:$16 sps:$4 sm:$0xff]  }
  0x8f   :  { %v3015_v15 = vld [vmem:[#allocation2 + $0x368] ss:$16 sps:$4 sm:$0xff]  }
  0x91   :  { %1854 = vmatpush1.bf16.msra.mxu0 %v2924_v16  ;;  %1895 = vmatpush1.bf16.msra.mxu1 %v2927_v17  ;;  %v3020_v16 = vld [vmem:[#allocation2 + $0x18c] ss:$16 sps:$4 sm:$0xff]  }
  0x92   :  { %1855 = vmatprep.subr.bf16.mxu0 %v2932_v18  ;;  %1896 = vmatprep.subr.bf16.mxu1 %v2935_v19  ;;  %v3023_v17 = vld [vmem:[#allocation2 + $0x38c] ss:$16 sps:$4 sm:$0xff]   ;;  %v3018_v18 = vld [vmem:[#allocation2 + $0x188] ss:$16 sps:$4 sm:$0xff]  }
  0x93   :  { %v3021_v19 = vld [vmem:[#allocation2 + $0x388] ss:$16 sps:$4 sm:$0xff]  }
  0x95   :  { %1856 = vmatpush1.bf16.msra.mxu0 %v2930_v22  ;;  %1897 = vmatpush1.bf16.msra.mxu1 %v2933_v23  ;;  %v3026_v22 = vld [vmem:[#allocation2 + $0x1ac] ss:$16 sps:$4 sm:$0xff]  }
  0x96   :  { %1857 = vmatprep.subr.bf16.mxu0 %v2938_v24  ;;  %1898 = vmatprep.subr.bf16.mxu1 %v2941_v25  ;;  %v3029_v23 = vld [vmem:[#allocation2 + $0x3ac] ss:$16 sps:$4 sm:$0xff]   ;;  %v3024_v24 = vld [vmem:[#allocation2 + $0x1a8] ss:$16 sps:$4 sm:$0xff]  }
  0x97   :  { %v3027_v25 = vld [vmem:[#allocation2 + $0x3a8] ss:$16 sps:$4 sm:$0xff]  }
  0x99   :  { %1858 = vmatpush1.bf16.msra.mxu0 %v2936_v26  ;;  %1899 = vmatpush1.bf16.msra.mxu1 %v2939_v27  ;;  %v3032_v26 = vld [vmem:[#allocation2 + $0x1cc] ss:$16 sps:$4 sm:$0xff]  }
  0x9a   :  { %1909 = vmatprep.subr.bf16.mxu0 %v2948_v28  ;;  %1950 = vmatprep.subr.bf16.mxu1 %v2951_v29  ;;  %v3035_v27 = vld [vmem:[#allocation2 + $0x3cc] ss:$16 sps:$4 sm:$0xff]   ;;  %v3030_v28 = vld [vmem:[#allocation2 + $0x1c8] ss:$16 sps:$4 sm:$0xff]  }
  0x9b   :  { %v3033_v29 = vld [vmem:[#allocation2 + $0x3c8] ss:$16 sps:$4 sm:$0xff]  }
  0x9c   :  { %1860 = vmatmul.mubr.bf16.vlgmr.msra.gmra.mrb[8].mxu0 %v3283_v30  ;;  %1901 = vmatmul.mubr.bf16.vlgmr.msra.gmra.mrb[8].mxu1 %v3287_v31 }
  0x9d   :  { %1910 = vmatpush1.bf16.msra.mxu0 %v2946_v32  ;;  %1951 = vmatpush1.bf16.msra.mxu1 %v2949_v33  ;;  %v3038_v32 = vld [vmem:[#allocation2 + $0x1ec] ss:$16 sps:$4 sm:$0xff]  }
  0x9e   :  { %1911 = vmatprep.subr.bf16.mxu0 %v2954_v34  ;;  %1952 = vmatprep.subr.bf16.mxu1 %v2957_v35  ;;  %v3041_v33 = vld [vmem:[#allocation2 + $0x3ec] ss:$16 sps:$4 sm:$0xff]   ;;  %v3036_v34 = vld [vmem:[#allocation2 + $0x1e8] ss:$16 sps:$4 sm:$0xff]  }
  0x9f   :  { %1941 = vmatprep.mubr.bf16.mxu0 %v3249_v59  ;;  %1982 = vmatprep.mubr.bf16.mxu1 %v3251_v60  ;;  %v2973_v59 = vld [vmem:[#allocation2 + $0x288] ss:$16 sps:$4 sm:$0xff]   ;;  %v2978_v60 = vld [vmem:[#allocation2 + $0xac] ss:$16 sps:$4 sm:$0xff]  }
  0xa0   :  { %v3039_v35 = vld [vmem:[#allocation2 + $0x3e8] ss:$16 sps:$4 sm:$0xff]  }
  0xa1   :  { %1912 = vmatpush1.bf16.msra.mxu0 %v2952_v36  ;;  %1953 = vmatpush1.bf16.msra.mxu1 %v2955_v37  ;;  %v3044_v36 = vld [vmem:[#allocation2 + $0x40c] ss:$16 sps:$4 sm:$0xff]  }
  0xa2   :  { %1913 = vmatprep.subr.bf16.mxu0 %v2960_v38  ;;  %1954 = vmatprep.subr.bf16.mxu1 %v2963_v39  ;;  %v3047_v37 = vld [vmem:[#allocation2 + $0x60c] ss:$16 sps:$4 sm:$0xff]   ;;  %v3042_v38 = vld [vmem:[#allocation2 + $0x408] ss:$16 sps:$4 sm:$0xff]  }
  0xa3   :  { %v3045_v39 = vld [vmem:[#allocation2 + $0x608] ss:$16 sps:$4 sm:$0xff]  }
  0xa5   :  { %1914 = vmatpush1.bf16.msra.mxu0 %v2958_v40  ;;  %1955 = vmatpush1.bf16.msra.mxu1 %v2961_v41  ;;  %v3050_v40 = vld [vmem:[#allocation2 + $0x42c] ss:$16 sps:$4 sm:$0xff]  }
  0xa6   :  { %1915 = vmatprep.subr.bf16.mxu0 %v2966_v42  ;;  %1956 = vmatprep.subr.bf16.mxu1 %v2969_v44  ;;  %v3053_v41 = vld [vmem:[#allocation2 + $0x62c] ss:$16 sps:$4 sm:$0xff]   ;;  %v3048_v42 = vld [vmem:[#allocation2 + $0x428] ss:$16 sps:$4 sm:$0xff]  }
  0xa7   :  { %v3051_v44 = vld [vmem:[#allocation2 + $0x628] ss:$16 sps:$4 sm:$0xff]  }
  0xa9   :  { %1916 = vmatpush1.bf16.msra.mxu0 %v2964_v45  ;;  %1957 = vmatpush1.bf16.msra.mxu1 %v2967_v47  ;;  %v3056_v45 = vld [vmem:[#allocation2 + $0x44c] ss:$16 sps:$4 sm:$0xff]  }
  0xaa   :  { %1917 = vmatprep.subr.bf16.mxu0 %v2972_v48  ;;  %1958 = vmatprep.subr.bf16.mxu1 %v2975_v49  ;;  %v3059_v47 = vld [vmem:[#allocation2 + $0x64c] ss:$16 sps:$4 sm:$0xff]   ;;  %v3054_v48 = vld [vmem:[#allocation2 + $0x448] ss:$16 sps:$4 sm:$0xff]  }
  0xab   :  { %v3057_v49 = vld [vmem:[#allocation2 + $0x648] ss:$16 sps:$4 sm:$0xff]  }
  0xad   :  { %1918 = vmatpush1.bf16.msra.mxu0 %v2970_v50  ;;  %1959 = vmatpush1.bf16.msra.mxu1 %v2973_v59  ;;  %v3060_v50 = vld [vmem:[#allocation2 + $0x468] ss:$16 sps:$4 sm:$0xff]  }
  0xae   :  { %1919 = vmatprep.subr.bf16.mxu0 %v2978_v60  ;;  %1960 = vmatprep.subr.bf16.mxu1 %v2981_v51  ;;  %v3063_v59 = vld [vmem:[#allocation2 + $0x668] ss:$16 sps:$4 sm:$0xff]   ;;  %v3068_v60 = vld [vmem:[#allocation2 + $0x48c] ss:$16 sps:$4 sm:$0xff]  }
  0xaf   :  { %v3071_v51 = vld [vmem:[#allocation2 + $0x68c] ss:$16 sps:$4 sm:$0xff]  }
  0xb1   :  { %1920 = vmatpush1.bf16.msra.mxu0 %v2976_v52  ;;  %1961 = vmatpush1.bf16.msra.mxu1 %v2979_v53  ;;  %v3074_v52 = vld [vmem:[#allocation2 + $0x4ac] ss:$16 sps:$4 sm:$0xff]  }
  0xb2   :  { %1921 = vmatprep.subr.bf16.mxu0 %v2984_v54  ;;  %1962 = vmatprep.subr.bf16.mxu1 %v2987_v55  ;;  %v3077_v53 = vld [vmem:[#allocation2 + $0x6ac] ss:$16 sps:$4 sm:$0xff]   ;;  %v3072_v54 = vld [vmem:[#allocation2 + $0x4a8] ss:$16 sps:$4 sm:$0xff]  }
  0xb3   :  { %v3075_v55 = vld [vmem:[#allocation2 + $0x6a8] ss:$16 sps:$4 sm:$0xff]  }
  0xb5   :  { %1922 = vmatpush1.bf16.msra.mxu0 %v2982_v56  ;;  %1963 = vmatpush1.bf16.msra.mxu1 %v2985_v57  ;;  %v3080_v56 = vld [vmem:[#allocation2 + $0x4cc] ss:$16 sps:$4 sm:$0xff]  }
  0xb6   :  { %1923 = vmatprep.subr.bf16.mxu0 %v2990_v58  ;;  %1964 = vmatprep.subr.bf16.mxu1 %v2993_v61  ;;  %v3083_v57 = vld [vmem:[#allocation2 + $0x6cc] ss:$16 sps:$4 sm:$0xff]  }
  0xb9   :  { %1924 = vmatpush1.bf16.msra.mxu0 %v2988_v62  ;;  %1965 = vmatpush1.bf16.msra.mxu1 %v2991_v63 }
  0xba   :  { %1925 = vmatprep.subr.bf16.mxu0 %v2996_v0  ;;  %1966 = vmatprep.subr.bf16.mxu1 %v2999_v1 }
  0xbd   :  { %1926 = vmatpush1.bf16.msra.mxu0 %v2994_v2  ;;  %1967 = vmatpush1.bf16.msra.mxu1 %v2997_v3  ;;  %v3078_v2 = vld [vmem:[#allocation2 + $0x4c8] ss:$16 sps:$4 sm:$0xff]  }
  0xbe   :  { %1927 = vmatprep.subr.bf16.mxu0 %v3002_v4  ;;  %1968 = vmatprep.subr.bf16.mxu1 %v3005_v5  ;;  %v3081_v3 = vld [vmem:[#allocation2 + $0x6c8] ss:$16 sps:$4 sm:$0xff]  }
  0xc1   :  { %1928 = vmatpush1.bf16.msra.mxu0 %v3000_v6  ;;  %1969 = vmatpush1.bf16.msra.mxu1 %v3003_v7  ;;  %v3086_v6 = vld [vmem:[#allocation2 + $0x4ec] ss:$16 sps:$4 sm:$0xff]  }
  0xc2   :  { %1929 = vmatprep.subr.bf16.mxu0 %v3008_v8  ;;  %1970 = vmatprep.subr.bf16.mxu1 %v3011_v9  ;;  %v3089_v7 = vld [vmem:[#allocation2 + $0x6ec] ss:$16 sps:$4 sm:$0xff]   ;;  %v3084_v8 = vld [vmem:[#allocation2 + $0x4e8] ss:$16 sps:$4 sm:$0xff]  }
  0xc3   :  { %v3087_v9 = vld [vmem:[#allocation2 + $0x6e8] ss:$16 sps:$4 sm:$0xff]  }
  0xc5   :  { %1930 = vmatpush1.bf16.msra.mxu0 %v3006_v10  ;;  %1971 = vmatpush1.bf16.msra.mxu1 %v3009_v11  ;;  %v3092_v10 = vld [vmem:[#allocation2 + $0x50c] ss:$16 sps:$4 sm:$0xff]  }
  0xc6   :  { %1931 = vmatprep.subr.bf16.mxu0 %v3014_v12  ;;  %1972 = vmatprep.subr.bf16.mxu1 %v3017_v13  ;;  %v3095_v11 = vld [vmem:[#allocation2 + $0x70c] ss:$16 sps:$4 sm:$0xff]   ;;  %v3090_v12 = vld [vmem:[#allocation2 + $0x508] ss:$16 sps:$4 sm:$0xff]  }
  0xc7   :  { %v3093_v13 = vld [vmem:[#allocation2 + $0x708] ss:$16 sps:$4 sm:$0xff]  }
  0xc9   :  { %1932 = vmatpush1.bf16.msra.mxu0 %v3012_v14  ;;  %1973 = vmatpush1.bf16.msra.mxu1 %v3015_v15  ;;  %v3098_v14 = vld [vmem:[#allocation2 + $0x52c] ss:$16 sps:$4 sm:$0xff]  }
  0xca   :  { %1933 = vmatprep.subr.bf16.mxu0 %v3020_v16  ;;  %1974 = vmatprep.subr.bf16.mxu1 %v3023_v17  ;;  %v3101_v15 = vld [vmem:[#allocation2 + $0x72c] ss:$16 sps:$4 sm:$0xff]   ;;  %v3096_v16 = vld [vmem:[#allocation2 + $0x528] ss:$16 sps:$4 sm:$0xff]  }
  0xcb   :  { %v3099_v17 = vld [vmem:[#allocation2 + $0x728] ss:$16 sps:$4 sm:$0xff]  }
  0xcd   :  { %1934 = vmatpush1.bf16.msra.mxu0 %v3018_v18  ;;  %1975 = vmatpush1.bf16.msra.mxu1 %v3021_v19  ;;  %v3104_v18 = vld [vmem:[#allocation2 + $0x54c] ss:$16 sps:$4 sm:$0xff]  }
  0xce   :  { %1935 = vmatprep.subr.bf16.mxu0 %v3026_v22  ;;  %1976 = vmatprep.subr.bf16.mxu1 %v3029_v23  ;;  %v3107_v19 = vld [vmem:[#allocation2 + $0x74c] ss:$16 sps:$4 sm:$0xff]   ;;  %v3102_v22 = vld [vmem:[#allocation2 + $0x548] ss:$16 sps:$4 sm:$0xff]  }
  0xcf   :  { %v3105_v23 = vld [vmem:[#allocation2 + $0x748] ss:$16 sps:$4 sm:$0xff]  }
  0xd1   :  { %1936 = vmatpush1.bf16.msra.mxu0 %v3024_v24  ;;  %1977 = vmatpush1.bf16.msra.mxu1 %v3027_v25  ;;  %v3110_v24 = vld [vmem:[#allocation2 + $0x56c] ss:$16 sps:$4 sm:$0xff]  }
  0xd2   :  { %1937 = vmatprep.subr.bf16.mxu0 %v3032_v26  ;;  %1978 = vmatprep.subr.bf16.mxu1 %v3035_v27  ;;  %v3113_v25 = vld [vmem:[#allocation2 + $0x76c] ss:$16 sps:$4 sm:$0xff]   ;;  %v3108_v26 = vld [vmem:[#allocation2 + $0x568] ss:$16 sps:$4 sm:$0xff]  }
  0xd3   :  { %v3111_v27 = vld [vmem:[#allocation2 + $0x768] ss:$16 sps:$4 sm:$0xff]  }
  0xd5   :  { %1938 = vmatpush1.bf16.msra.mxu0 %v3030_v28  ;;  %1979 = vmatpush1.bf16.msra.mxu1 %v3033_v29  ;;  %v3116_v28 = vld [vmem:[#allocation2 + $0x58c] ss:$16 sps:$4 sm:$0xff]  }
  0xd6   :  { %1939 = vmatprep.subr.bf16.mxu0 %v3038_v32  ;;  %1980 = vmatprep.subr.bf16.mxu1 %v3041_v33  ;;  %v3119_v29 = vld [vmem:[#allocation2 + $0x78c] ss:$16 sps:$4 sm:$0xff]   ;;  %v3114_v32 = vld [vmem:[#allocation2 + $0x588] ss:$16 sps:$4 sm:$0xff]  }
  0xd7   :  { %v3117_v33 = vld [vmem:[#allocation2 + $0x788] ss:$16 sps:$4 sm:$0xff]  }
  0xd9   :  { %1940 = vmatpush1.bf16.msra.mxu0 %v3036_v34  ;;  %1981 = vmatpush1.bf16.msra.mxu1 %v3039_v35  ;;  %v3122_v34 = vld [vmem:[#allocation2 + $0x5ac] ss:$16 sps:$4 sm:$0xff]  }
  0xda   :  { %1991 = vmatprep.subr.bf16.mxu0 %v3044_v36  ;;  %2032 = vmatprep.subr.bf16.mxu1 %v3047_v37  ;;  %v3125_v35 = vld [vmem:[#allocation2 + $0x7ac] ss:$16 sps:$4 sm:$0xff]   ;;  %v3120_v36 = vld [vmem:[#allocation2 + $0x5a8] ss:$16 sps:$4 sm:$0xff]  }
  0xdb   :  { %v3123_v37 = vld [vmem:[#allocation2 + $0x7a8] ss:$16 sps:$4 sm:$0xff]  }
  0xdc   :  { %1942 = vmatmul.mubr.bf16.vlgmr.msra.gmra.mrb[12].mxu0 %v3255_v20  ;;  %1983 = vmatmul.mubr.bf16.vlgmr.msra.gmra.mrb[12].mxu1 %v3257_v21  ;;  %v3062_v20 = vld [vmem:[#allocation2 + $0x46c] ss:$16 sps:$4 sm:$0xff]  }
  0xdd   :  { %1992 = vmatpush1.bf16.msra.mxu0 %v3042_v38  ;;  %2033 = vmatpush1.bf16.msra.mxu1 %v3045_v39  ;;  %v3065_v21 = vld [vmem:[#allocation2 + $0x66c] ss:$16 sps:$4 sm:$0xff]  }
  0xde   :  { %1993 = vmatprep.subr.bf16.mxu0 %v3050_v40  ;;  %2034 = vmatprep.subr.bf16.mxu1 %v3053_v41  ;;  %v3128_v38 = vld [vmem:[#allocation2 + $0x5cc] ss:$16 sps:$4 sm:$0xff]   ;;  %v3126_v40 = vld [vmem:[#allocation2 + $0x5c8] ss:$16 sps:$4 sm:$0xff]  }
  0xdf   :  { %2023 = vmatprep.mubr.bf16.mxu0 %v3268_v43  ;;  %2064 = vmatprep.mubr.bf16.mxu1 %v3277_v46  ;;  %v3066_v43 = vld [vmem:[#allocation2 + $0x488] ss:$16 sps:$4 sm:$0xff]   ;;  %v3131_v39 = vld [vmem:[#allocation2 + $0x7cc] ss:$16 sps:$4 sm:$0xff]  }
  0xe0   :  { %v3069_v46 = vld [vmem:[#allocation2 + $0x688] ss:$16 sps:$4 sm:$0xff]  }
  0xe1   :  { %1994 = vmatpush1.bf16.msra.mxu0 %v3048_v42  ;;  %2035 = vmatpush1.bf16.msra.mxu1 %v3051_v44  ;;  %v3129_v41 = vld [vmem:[#allocation2 + $0x7c8] ss:$16 sps:$4 sm:$0xff]   ;;  %v3134_v42 = vld [vmem:[#allocation2 + $0x5ec] ss:$16 sps:$4 sm:$0xff]  }
  0xe2   :  { %1995 = vmatprep.subr.bf16.mxu0 %v3056_v45  ;;  %2036 = vmatprep.subr.bf16.mxu1 %v3059_v47  ;;  %v3137_v44 = vld [vmem:[#allocation2 + $0x7ec] ss:$16 sps:$4 sm:$0xff]   ;;  %v2119_v45 = vld [vmem:[%s3529_s5 + $0x80] sm:$0xff] }
  0xe3   :  { %v2120_v47 = vld [vmem:[%s3529_s5 + $0x88] sm:$0xff] }
  0xe5   :  { %1996 = vmatpush1.bf16.msra.mxu0 %v3054_v48  ;;  %2037 = vmatpush1.bf16.msra.mxu1 %v3057_v49  ;;  %v3132_v48 = vld [vmem:[#allocation2 + $0x5e8] ss:$16 sps:$4 sm:$0xff]  }
  0xe6   :  { %1997 = vmatprep.subr.bf16.mxu0 %v3062_v20  ;;  %2038 = vmatprep.subr.bf16.mxu1 %v3065_v21  ;;  %v3135_v49 = vld [vmem:[#allocation2 + $0x7e8] ss:$16 sps:$4 sm:$0xff]   ;;  %v2668_v20 = vpack.c.bf16 %v2120_v47, %v2119_v45  ;;  %v2103_v21 = vld [vmem:[%s3529_s5] sm:$0xff] }
  0xe7   :  { %v2152_v45 = vld [vmem:[%s3529_s5 + $0x188] sm:$0xff]  ;;  %v2135_v47 = vld [vmem:[%s3529_s5 + $0x100] sm:$0xff] }
  0xe9   :  { %1998 = vmatpush1.bf16.msra.mxu0 %v3060_v50  ;;  %2039 = vmatpush1.bf16.msra.mxu1 %v3063_v59  ;;  %v2104_v50 = vld [vmem:[%s3529_s5 + $0x8] sm:$0xff]  ;;  %v2121_v59 = vld [vmem:[%s3529_s5 + $0x90] sm:$0xff] }
  0xea   :  { %1999 = vmatprep.subr.bf16.mxu0 %v3068_v60  ;;  %2040 = vmatprep.subr.bf16.mxu1 %v3071_v51  ;;  %v2122_v60 = vld [vmem:[%s3529_s5 + $0x98] sm:$0xff]  ;;  %v2670_v51 = vpack.c.bf16 %v2104_v50, %v2103_v21 }
  0xeb   :  { %v2154_v21 = vld [vmem:[%s3529_s5 + $0x198] sm:$0xff] }
  0xed   :  { %2000 = vmatpush1.bf16.msra.mxu0 %v3066_v43  ;;  %2041 = vmatpush1.bf16.msra.mxu1 %v3069_v46  ;;  %v2672_v43 = vpack.c.bf16 %v2122_v60, %v2121_v59  ;;  %v2105_v46 = vld [vmem:[%s3529_s5 + $0x10] sm:$0xff] }
  0xee   :  { %2001 = vmatprep.subr.bf16.mxu0 %v3074_v52  ;;  %2042 = vmatprep.subr.bf16.mxu1 %v3077_v53  ;;  %v2106_v52 = vld [vmem:[%s3529_s5 + $0x18] sm:$0xff]  ;;  %v2123_v53 = vld [vmem:[%s3529_s5 + $0xa0] sm:$0xff] }
  0xef   :  { %v3297_v58 = vpop.f32.mrb[0].mxu0  ;;  %v3299_v61 = vpop.f32.mrb[0].mxu1 }
  0xf0   :  { %v3301_v62 = vpop.f32.mrb[1].mxu0  ;;  %v3303_v63 = vpop.f32.mrb[1].mxu1 }
  0xf1   :  { %v393_v0 = vpop.f32.mrb[2].mxu0  ;;  %v434_v1 = vpop.f32.mrb[2].mxu1  ;;  %2002 = vmatpush1.bf16.msra.mxu0 %v3072_v54  ;;  %2043 = vmatpush1.bf16.msra.mxu1 %v3075_v55  ;;  %v2124_v54 = vld [vmem:[%s3529_s5 + $0xa8] sm:$0xff]  ;;  %v2674_v55 = vpack.c.bf16 %v2106_v52, %v2105_v46  ;;  %v2155_v46 = vld [vmem:[%s3529_s5 + $0x1a0] sm:$0xff] }
  0xf2   :  { %v394_v4 = vpop.f32.mrb[3].mxu0  ;;  %v435_v5 = vpop.f32.mrb[3].mxu1  ;;  %2003 = vmatprep.subr.bf16.mxu0 %v3080_v56  ;;  %2044 = vmatprep.subr.bf16.mxu1 %v3083_v57  ;;  %v2676_v56 = vpack.c.bf16 %v2124_v54, %v2123_v53  ;;  %v2107_v57 = vld [vmem:[%s3529_s5 + $0x20] sm:$0xff]  ;;  %v2108_v0 = vld [vmem:[%s3529_s5 + $0x28] sm:$0xff]  ;;  %v2125_v1 = vld [vmem:[%s3529_s5 + $0xb0] sm:$0xff] }
  0xf3   :  { %v2110_v4 = vld [vmem:[%s3529_s5 + $0x38] sm:$0xff]  ;;  %v2127_v5 = vld [vmem:[%s3529_s5 + $0xc0] sm:$0xff]  ;;  %v2156_v52 = vld [vmem:[%s3529_s5 + $0x1a8] sm:$0xff] }
  0xf4   :  { %v2708_v54 = vpack.c.bf16 %v2156_v52, %v2155_v46 }
  0xf5   :  { %2004 = vmatpush1.bf16.msra.mxu0 %v3078_v2  ;;  %2045 = vmatpush1.bf16.msra.mxu1 %v3081_v3  ;;  %v2109_v3 = vld [vmem:[%s3529_s5 + $0x30] sm:$0xff] }
  0xf6   :  { %2005 = vmatprep.subr.bf16.mxu0 %v3086_v6  ;;  %2046 = vmatprep.subr.bf16.mxu1 %v3089_v7  ;;  %v2128_v6 = vld [vmem:[%s3529_s5 + $0xc8] sm:$0xff]  ;;  %v2682_v7 = vpack.c.bf16 %v2110_v4, %v2109_v3  ;;  %v2159_v3 = vld [vmem:[%s3529_s5 + $0x1c0] sm:$0xff] }
  0xf7   :  { %v2160_v4 = vld [vmem:[%s3529_s5 + $0x1c8] sm:$0xff] }
  0xf9   :  { %2006 = vmatpush1.bf16.msra.mxu0 %v3084_v8  ;;  %2047 = vmatpush1.bf16.msra.mxu1 %v3087_v9  ;;  %v2684_v8 = vpack.c.bf16 %v2128_v6, %v2127_v5  ;;  %v2111_v9 = vld [vmem:[%s3529_s5 + $0x40] sm:$0xff]  ;;  %v2716_v6 = vpack.c.bf16 %v2160_v4, %v2159_v3 }
  0xfa   :  { %2007 = vmatprep.subr.bf16.mxu0 %v3092_v10  ;;  %2048 = vmatprep.subr.bf16.mxu1 %v3095_v11  ;;  %v2112_v10 = vld [vmem:[%s3529_s5 + $0x48] sm:$0xff]  ;;  %v2129_v11 = vld [vmem:[%s3529_s5 + $0xd0] sm:$0xff] }
  0xfd   :  { %2008 = vmatpush1.bf16.msra.mxu0 %v3090_v12  ;;  %2049 = vmatpush1.bf16.msra.mxu1 %v3093_v13  ;;  %v2130_v12 = vld [vmem:[%s3529_s5 + $0xd8] sm:$0xff]  ;;  %v2686_v13 = vpack.c.bf16 %v2112_v10, %v2111_v9  ;;  %v2161_v9 = vld [vmem:[%s3529_s5 + $0x1d0] sm:$0xff] }
  0xfe   :  { %2009 = vmatprep.subr.bf16.mxu0 %v3098_v14  ;;  %2050 = vmatprep.subr.bf16.mxu1 %v3101_v15  ;;  %v2688_v14 = vpack.c.bf16 %v2130_v12, %v2129_v11  ;;  %v2113_v15 = vld [vmem:[%s3529_s5 + $0x50] sm:$0xff]  ;;  %v2162_v10 = vld [vmem:[%s3529_s5 + $0x1d8] sm:$0xff] }
  0xff   :  { %v2720_v12 = vpack.c.bf16 %v2162_v10, %v2161_v9 }
 0x101   :  { %2010 = vmatpush1.bf16.msra.mxu0 %v3096_v16  ;;  %2051 = vmatpush1.bf16.msra.mxu1 %v3099_v17  ;;  %v2114_v16 = vld [vmem:[%s3529_s5 + $0x58] sm:$0xff]  ;;  %v2131_v17 = vld [vmem:[%s3529_s5 + $0xe0] sm:$0xff] }
 0x102   :  { %2011 = vmatprep.subr.bf16.mxu0 %v3104_v18  ;;  %2052 = vmatprep.subr.bf16.mxu1 %v3107_v19  ;;  %v2132_v18 = vld [vmem:[%s3529_s5 + $0xe8] sm:$0xff]  ;;  %v2690_v19 = vpack.c.bf16 %v2114_v16, %v2113_v15  ;;  %v2145_v16 = vld [vmem:[%s3529_s5 + $0x150] sm:$0xff] }
 0x105   :  { %2012 = vmatpush1.bf16.msra.mxu0 %v3102_v22  ;;  %2053 = vmatpush1.bf16.msra.mxu1 %v3105_v23  ;;  %v2692_v22 = vpack.c.bf16 %v2132_v18, %v2131_v17  ;;  %v2115_v23 = vld [vmem:[%s3529_s5 + $0x60] sm:$0xff]  ;;  %v2146_v17 = vld [vmem:[%s3529_s5 + $0x158] sm:$0xff] }
 0x106   :  { %2013 = vmatprep.subr.bf16.mxu0 %v3110_v24  ;;  %2054 = vmatprep.subr.bf16.mxu1 %v3113_v25  ;;  %v2116_v24 = vld [vmem:[%s3529_s5 + $0x68] sm:$0xff]  ;;  %v2073_v18 = vld [vmem:[%s3528_s4] sm:$0xf] }
 0x109   :  { %2014 = vmatpush1.bf16.msra.mxu0 %v3108_v26  ;;  %2055 = vmatpush1.bf16.msra.mxu1 %v3111_v27  ;;  %v2133_v27 = vld [vmem:[%s3529_s5 + $0xf0] sm:$0xff] }
 0x10a   :  { %2015 = vmatprep.subr.bf16.mxu0 %v3116_v28  ;;  %2056 = vmatprep.subr.bf16.mxu1 %v3119_v29  ;;  %v2134_v28 = vld [vmem:[%s3529_s5 + $0xf8] sm:$0xff] }
 0x10d   :  { %2016 = vmatpush1.bf16.msra.mxu0 %v3114_v32  ;;  %2057 = vmatpush1.bf16.msra.mxu1 %v3117_v33 }
 0x10e   :  { %2017 = vmatprep.subr.bf16.mxu0 %v3122_v34  ;;  %2058 = vmatprep.subr.bf16.mxu1 %v3125_v35 }
 0x111   :  { %2018 = vmatpush1.bf16.msra.mxu0 %v3120_v36  ;;  %2059 = vmatpush1.bf16.msra.mxu1 %v3123_v37  ;;  %v2694_v37 = vpack.c.bf16 %v2116_v24, %v2115_v23 }
 0x112   :  { %2019 = vmatprep.subr.bf16.mxu0 %v3128_v38  ;;  %2060 = vmatprep.subr.bf16.mxu1 %v3131_v39 }
 0x115   :  { %2020 = vmatpush1.bf16.msra.mxu0 %v3126_v40  ;;  %2061 = vmatpush1.bf16.msra.mxu1 %v3129_v41  ;;  %v2696_v41 = vpack.c.bf16 %v2134_v28, %v2133_v27 }
 0x116   :  { %2021 = vmatprep.subr.bf16.mxu0 %v3134_v42  ;;  %2062 = vmatprep.subr.bf16.mxu1 %v3137_v44  ;;  %v2117_v42 = vld [vmem:[%s3529_s5 + $0x70] sm:$0xff] }
 0x119   :  { %2022 = vmatpush1.bf16.msra.mxu0 %v3132_v48  ;;  %2063 = vmatpush1.bf16.msra.mxu1 %v3135_v49  ;;  %v2136_v49 = vld [vmem:[%s3529_s5 + $0x108] sm:$0xff] }
 0x11a   :  { %2669 = vmatprep.subr.bf16.mxu0 %v2668_v20  ;;  %v2153_v20 = vld [vmem:[%s3529_s5 + $0x190] sm:$0xff]  ;;  %v2702_v59 = vpack.c.bf16 %v2136_v49, %v2135_v47  ;;  %v2166_v47 = vld [vmem:[%s3529_s5 + $0x1f8] sm:$0xff] }
 0x11b   :  { %v2704_v60 = vpack.c.bf16 %v2154_v21, %v2153_v20  ;;  %v2149_v49 = vld [vmem:[%s3529_s5 + $0x170] sm:$0xff]  ;;  %v2150_v20 = vld [vmem:[%s3529_s5 + $0x178] sm:$0xff] }
 0x11c   :  { %2024 = vmatmul.mubr.bf16.vlgmr.msra.gmra.mrb[16].mxu0 %v3283_v30  ;;  %2065 = vmatmul.mubr.bf16.vlgmr.msra.gmra.mrb[16].mxu1 %v3287_v31  ;;  %v2126_v30 = vld [vmem:[%s3529_s5 + $0xb8] sm:$0xff]  ;;  %v2678_v31 = vpack.c.bf16 %v2108_v0, %v2107_v57  ;;  %v2157_v57 = vld [vmem:[%s3529_s5 + $0x1b0] sm:$0xff] }
 0x11d   :  { %2671 = vmatpush3.bf16.msra.mxu0 %v2670_v51  ;;  %v2680_v2 = vpack.c.bf16 %v2126_v30, %v2125_v1  ;;  %v2137_v51 = vld [vmem:[%s3529_s5 + $0x110] sm:$0xff]  ;;  %v2158_v0 = vld [vmem:[%s3529_s5 + $0x1b8] sm:$0xff] }
 0x11e   :  { %2673 = vmatprep.subr.bf16.mxu0 %v2672_v43  ;;  %v2138_v43 = vld [vmem:[%s3529_s5 + $0x118] sm:$0xff]  ;;  %v2712_v30 = vpack.c.bf16 %v2158_v0, %v2157_v57 }
 0x11f   :  { %v2706_v53 = vpack.c.bf16 %v2138_v43, %v2137_v51 }
 0x121   :  { %2675 = vmatpush3.bf16.msra.mxu0 %v2674_v55  ;;  %v2139_v55 = vld [vmem:[%s3529_s5 + $0x120] sm:$0xff] }
 0x122   :  { %2677 = vmatprep.subr.bf16.mxu0 %v2676_v56  ;;  %v2140_v56 = vld [vmem:[%s3529_s5 + $0x128] sm:$0xff] }
 0x123   :  { %v2710_v1 = vpack.c.bf16 %v2140_v56, %v2139_v55 }
 0x125   :  { %2679 = vmatpush3.bf16.msra.mxu0 %v2678_v31  ;;  %v2141_v31 = vld [vmem:[%s3529_s5 + $0x130] sm:$0xff] }
 0x126   :  { %2681 = vmatprep.subr.bf16.mxu0 %v2680_v2  ;;  %v2142_v2 = vld [vmem:[%s3529_s5 + $0x138] sm:$0xff] }
 0x127   :  { %v2714_v5 = vpack.c.bf16 %v2142_v2, %v2141_v31 }
 0x129   :  { %2683 = vmatpush3.bf16.msra.mxu0 %v2682_v7  ;;  %v2143_v7 = vld [vmem:[%s3529_s5 + $0x140] sm:$0xff] }
 0x12a   :  { %2685 = vmatprep.subr.bf16.mxu0 %v2684_v8  ;;  %v2144_v8 = vld [vmem:[%s3529_s5 + $0x148] sm:$0xff] }
 0x12b   :  { %v2718_v11 = vpack.c.bf16 %v2144_v8, %v2143_v7 }
 0x12d   :  { %2687 = vmatpush3.bf16.msra.mxu0 %v2686_v13  ;;  %v2075_v13 = vlaneseq }
 0x12e   :  { %2689 = vmatprep.subr.bf16.mxu0 %v2688_v14 }
 0x12f   :  { %v1779_v25 = vpop.f32.mrb[4].mxu0  ;;  %v1820_v26 = vpop.f32.mrb[4].mxu1  ;;  %v3475_v14 = vshrl.u32 %v2075_v13, 7 }
 0x130   :  { %v1780_v29 = vadd.f32 %v1779_v25, %v3297_v58  ;;  %v1781_v32 = vpop.f32.mrb[5].mxu0  ;;  %v1822_v33 = vpop.f32.mrb[5].mxu1  ;;  %v2118_v58 = vld [vmem:[%s3529_s5 + $0x78] sm:$0xff]  ;;  %v2163_v25 = vld [vmem:[%s3529_s5 + $0x1e0] sm:$0xff] }
 0x131   :  { %v1782_v34 = vadd.f32 %v1781_v32, %v3301_v62  ;;  %v1783_v35 = vpop.f32.mrb[6].mxu0  ;;  %v1824_v36 = vpop.f32.mrb[6].mxu1  ;;  %2691 = vmatpush3.bf16.msra.mxu0 %v2690_v19  ;;  %v2151_v62 = vld [vmem:[%s3529_s5 + $0x180] sm:$0xff]  ;;  %v2698_v50 = vpack.c.bf16 %v2118_v58, %v2117_v42  ;;  %v2077_v15 = vsub.s32 0, %v3475_v14  ;;  %v2081_v19 = vsub.s32 1, %v3475_v14 }
 0x132   :  { %v3399_v38 = vadd.f32 %v1820_v26, %v1780_v29  ;;  %v1784_v39 = vpop.f32.mrb[7].mxu0  ;;  %v1825_v40 = vpop.f32.mrb[7].mxu1  ;;  %2693 = vmatprep.subr.bf16.mxu0 %v2692_v22  ;;  %v2700_v48 = vpack.c.bf16 %v2152_v45, %v2151_v62  ;;  %v2722_v22 = vpack.c.bf16 %v2146_v17, %v2145_v16  ;;  %v2164_v26 = vld [vmem:[%s3529_s5 + $0x1e8] sm:$0xff]  ;;  %v2165_v45 = vld [vmem:[%s3529_s5 + $0x1f0] sm:$0xff]  ;;  %v2085_v31 = vsub.s32 2, %v3475_v14 }
 0x133   :  { %v3407_v44 = vadd.f32 %v1822_v33, %v1782_v34  ;;  %v2078_v28 = vrot.slane %v2073_v18, %v2077_v15  ;;  %v2724_v33 = vpack.c.bf16 %v2164_v26, %v2163_v25  ;;  %v2147_v34 = vld [vmem:[%s3529_s5 + $0x160] sm:$0xff]  ;;  %v2148_v35 = vld [vmem:[%s3529_s5 + $0x168] sm:$0xff]  ;;  %v2089_v2 = vsub.s32 3, %v3475_v14 }
 0x134   :  { %2701 = vmatprep.subr.bf16.mxu1 %v2700_v48  ;;  %v2597_v25 = vld [vmem:[%s3530_s6] ss:$0 sm:$0xff] }
 0x135   :  { %2695 = vmatpush3.bf16.msra.mxu0 %v2694_v37  ;;  %2703 = vmatpush3.bf16.msra.mxu1 %v2702_v59  ;;  %v2082_v37 = vrot.slane %v2073_v18, %v2081_v19  ;;  %v2090_v9 = vrot.slane %v2073_v18, %v2089_v2 }
 0x136   :  { %2697 = vmatprep.subr.bf16.mxu0 %v2696_v41  ;;  %2705 = vmatprep.subr.bf16.mxu1 %v2704_v60  ;;  %v2726_v41 = vpack.c.bf16 %v2148_v35, %v2147_v34 }
 0x139   :  { %2699 = vmatpush3.bf16.msra.mxu0 %v2698_v50  ;;  %2707 = vmatpush3.bf16.msra.mxu1 %v2706_v53  ;;  %v2730_v50 = vpack.c.bf16 %v2150_v20, %v2149_v49 }
 0x13a   :  { %2709 = vmatprep.subr.bf16.mxu1 %v2708_v54 }
 0x13d   :  { %2711 = vmatpush3.bf16.msra.mxu1 %v2710_v1 }
 0x13e   :  { %2713 = vmatprep.subr.bf16.mxu1 %v2712_v30 }
 0x141   :  { %2715 = vmatpush3.bf16.msra.mxu1 %v2714_v5 }
 0x142   :  { %2717 = vmatprep.subr.bf16.mxu1 %v2716_v6  ;;  %v2086_v6 = vrot.slane %v2073_v18, %v2085_v31 }
 0x145   :  { %2719 = vmatpush3.bf16.msra.mxu1 %v2718_v11 }
 0x146   :  { %2721 = vmatprep.subr.bf16.mxu1 %v2720_v12 }
 0x149   :  { %2723 = vmatpush3.bf16.msra.mxu1 %v2722_v22 }
 0x14a   :  { %2725 = vmatprep.subr.bf16.mxu1 %v2724_v33 }
 0x14d   :  { %2727 = vmatpush3.bf16.msra.mxu1 %v2726_v41 }
 0x16f   :  { %v1861_v23 = vpop.f32.mrb[8].mxu0  ;;  %v1902_v24 = vpop.f32.mrb[8].mxu1 }
 0x170   :  { %v1862_v27 = vadd.f32 %v1861_v23, %v3399_v38  ;;  %v1863_v29 = vpop.f32.mrb[9].mxu0  ;;  %v1904_v32 = vpop.f32.mrb[9].mxu1 }
 0x171   :  { %v1864_v36 = vadd.f32 %v1863_v29, %v3407_v44  ;;  %v1865_v39 = vpop.f32.mrb[10].mxu0  ;;  %v1906_v40 = vpop.f32.mrb[10].mxu1  ;;  %v2728_v44 = vpack.c.bf16 %v2166_v47, %v2165_v45 }
 0x172   :  { %v1903_v42 = vadd.f32 %v1902_v24, %v1862_v27  ;;  %v1866_v38 = vpop.f32.mrb[11].mxu0  ;;  %v1907_v58 = vpop.f32.mrb[11].mxu1 }
 0x173   :  { %v1905_v62 = vadd.f32 %v1904_v32, %v1864_v36  ;;  %2729 = vmatprep.subr.bf16.mxu1 %v2728_v44 }
 0x174   :  { %v2095_v48 = vadd.f32 %v2078_v28, %v1903_v42  ;;  %2731 = vmatpush3.bf16.msra.mxu1 %v2730_v50 }
 0x175   :  { %v2096_v21 = vadd.f32 %v2082_v37, %v1905_v62 }
 0x176   :  { %v2099_v60 = vmax.f32 %v2095_v48, 0.0 }
 0x177   :  { %v2100_v59 = vmax.f32 %v2096_v21, 0.0 }
 0x179   :  { %2238 = vmatprep.mubr.f32.mxu0 %v2100_v59 }
 0x17a   :  { %2239 = vmatmul.mubr.f32.vlgmr.msra.gmra.mrb[20].mxu0 %v2099_v60 }
 0x1af   :  { %v1943_v51 = vpop.f32.mrb[12].mxu0  ;;  %v1984_v43 = vpop.f32.mrb[12].mxu1 }
 0x1b0   :  { %v1944_v46 = vadd.f32 %v1943_v51, %v3299_v61  ;;  %v1945_v52 = vpop.f32.mrb[13].mxu0  ;;  %v1986_v53 = vpop.f32.mrb[13].mxu1 }
 0x1b1   :  { %v1946_v54 = vadd.f32 %v1945_v52, %v3303_v63  ;;  %v1947_v55 = vpop.f32.mrb[14].mxu0  ;;  %v1988_v56 = vpop.f32.mrb[14].mxu1 }
 0x1b2   :  { %v1985_v57 = vadd.f32 %v1984_v43, %v1944_v46  ;;  %v1948_v0 = vpop.f32.mrb[15].mxu0  ;;  %v1989_v1 = vpop.f32.mrb[15].mxu1 }
 0x1b3   :  { %v1987_v30 = vadd.f32 %v1986_v53, %v1946_v54 }
 0x1ef   :  { %v2025_v3 = vpop.f32.mrb[16].mxu0  ;;  %v2066_v4 = vpop.f32.mrb[16].mxu1 }
 0x1f0   :  { %v2026_v5 = vadd.f32 %v2025_v3, %v1985_v57  ;;  %v2027_v7 = vpop.f32.mrb[17].mxu0  ;;  %v2068_v61 = vpop.f32.mrb[17].mxu1 }
 0x1f1   :  { %v2028_v8 = vadd.f32 %v2027_v7, %v1987_v30  ;;  %v2029_v10 = vpop.f32.mrb[18].mxu0  ;;  %v2070_v63 = vpop.f32.mrb[18].mxu1 }
 0x1f2   :  { %v2067_v11 = vadd.f32 %v2066_v4, %v2026_v5  ;;  %v2030_v12 = vpop.f32.mrb[19].mxu0  ;;  %v2071_v13 = vpop.f32.mrb[19].mxu1 }
 0x1f3   :  { %v2069_v15 = vadd.f32 %v2068_v61, %v2028_v8 }
 0x1f4   :  { %v2097_v16 = vadd.f32 %v2086_v6, %v2067_v11 }
 0x1f5   :  { %v2098_v17 = vadd.f32 %v2090_v9, %v2069_v15 }
 0x1f6   :  { %v2101_v22 = vmax.f32 %v2097_v16, 0.0 }
 0x1f7   :  { %v2102_v19 = vmax.f32 %v2098_v17, 0.0 }
 0x1f9   :  { %2308 = vmatprep.mubr.f32.mxu1 %v2102_v19 }
 0x1fa   :  { %2309 = vmatmul.mubr.f32.vlgmr.msra.gmra.mrb[20].mxu1 %v2101_v22 }
 0x24d   :  { %v2630_v14 = vpop.f32.mrb[20].mxu0 }
 0x24e   :  { %v2631_v23 = vpop.f32.mrb[21].mxu0 }
 0x24f   :  { %v2632_v24 = vadd.f32 %v2631_v23, %v2630_v14 }
 0x251   :  { %v2241_v27 = vadd.f32 %v2632_v24, %v2597_v25 }
 0x2cd   :  { %v2665_v18 = vpop.f32.mrb[20].mxu1 }
 0x2ce   :  { %v2666_v26 = vpop.f32.mrb[21].mxu1 }
 0x2cf   :  { %v2667_v28 = vadd.f32 %v2666_v26, %v2665_v18 }
 0x2d1   :  { %v2311_v29 = vadd.f32 %v2667_v28, %v2241_v27 }
 0x2d3   :  { %2315 = vst.msk [vmem:[%s3531_s7] sm:$0xff] %vm2314_vm2, %v2311_v29 }
 0x2d4   :  { %2320 = vsyncpa [#allocation3], 1 }

</bundles_post_ra>
